<compile_context>
chip_gen: v6e
topology: v6e:2x2x1
jax: 0.10.0
libtpu: 0.0.40
codegen_flags: <defaults>
</compile_context>

<pallas_src>
import math
import jax
import jax.numpy as jnp
from jax import lax
from jax.experimental import pallas as pl
from jax.experimental.pallas import tpu as pltpu


# ------------------------------ Fused kernel ----------------------------------

def _make_fused_kernel(S, Bp, H, Din0, L, O):
    G = 4 * H          # gate columns, order [i, f, g, o]
    SB = S * Bp

    def kernel(x_ref, wih_ref, whh_ref, b_ref, h0_ref, c0_ref,
               wlin_ref, blin_ref, out_ref, hN_ref, cN_ref, yseq_sc):
        # Hoisted lane mask selecting the 'g' (cell candidate) gate columns.
        lane = lax.broadcasted_iota(jnp.int32, (Bp, G), 1)
        g_mask = (lane >= 2 * H) & (lane < 3 * H)

        layer_in = x_ref[...]                       # (S*Bp, Din0), pre-flattened
        for l in range(L):
            D_l = Din0 if l == 0 else H
            whh_l = whh_ref[l]                      # (H, 4H), loop-invariant
            # One batched input projection per layer, bias folded in.
            # This is the only place the x-contraction happens: off the chain.
            gx = jnp.dot(layer_in, wih_ref[l, 0:D_l, :],
                         preferred_element_type=jnp.float32) + b_ref[l]
            h = h0_ref[l]                           # (Bp, H) f32, stays in vregs
            c = c0_ref[l]
            for t in range(S):                      # fully unrolled recurrence
                gates = jnp.dot(h, whh_l, preferred_element_type=jnp.float32) \
                        + gx[t * Bp:(t + 1) * Bp, :]
                # i/f/o columns were pre-scaled by 0.5 in the wrapper:
                #   sigmoid(z) = 0.5*tanh(z/2) + 0.5 ; g columns keep tanh(z).
                th = jnp.tanh(gates)
                act = jnp.where(g_mask, th, 0.5 * th + 0.5)
                i_g = act[:, 0 * H:1 * H]
                f_g = act[:, 1 * H:2 * H]
                g_g = act[:, 2 * H:3 * H]
                o_g = act[:, 3 * H:4 * H]
                c = f_g * c + i_g * g_g
                h = o_g * jnp.tanh(c)
                # Aligned full-sublane store, off the h->h dependency chain.
                yseq_sc[t * Bp:(t + 1) * Bp, :] = h
            hN_ref[l] = h
            cN_ref[l] = c
            if l < L - 1:
                layer_in = yseq_sc[...]             # next layer's input (VMEM only)

        # Extract batch-0 rows (0, Bp, 2Bp, ...) of the last layer's outputs with a
        # tiny selection matmul (iota + compare + dot only), then fused linear+sigmoid.
        row = lax.broadcasted_iota(jnp.int32, (S, SB), 0)
        col = lax.broadcasted_iota(jnp.int32, (S, SB), 1)
        sel = (col == row * Bp).astype(jnp.float32)
        hout = jnp.dot(sel, yseq_sc[...], preferred_element_type=jnp.float32)   # (S, H)
        logits = jnp.dot(hout, wlin_ref[...],
                         preferred_element_type=jnp.float32) + blin_ref[...]
        out_ref[...] = jax.nn.sigmoid(logits)

    return kernel


# ------------------------------ Module wrapper ---------------------------------

def lstm_for_bceloss_hidden_forward(x, hidden, layer_params, w_lin_t, b_lin):
    """Replicates LSTM_for_BCELoss_hidden.forward with one fused Pallas kernel.

    layer_params: list of (W_ih^T (D_l,4H), W_hh^T (H,4H), bias (1,4H) = b_ih+b_hh),
                  UNscaled (PyTorch semantics).
    """
    h0, c0 = hidden
    S, B, Din0 = x.shape
    L, _, H = h0.shape
    O = w_lin_t.shape[1]
    G = 4 * H
    Dmax = max(Din0, H)
    Bp = ((B + 7) // 8) * 8            # pad batch to the sublane width

    # Pre-scale i/f/o gate columns by 0.5 so the kernel uses a single tanh:
    # sigmoid(z) = 0.5*tanh(z/2)+0.5 on those lanes (multiplying by 0.5 is exact).
    col = jnp.arange(G)
    gate_scale = jnp.where((col >= 2 * H) & (col < 3 * H), 1.0, 0.5).astype(jnp.float32)

    wih_rows, whh_rows, b_rows = [], [], []
    for (wih_t, whh_t, bias) in layer_params:
        din = wih_t.shape[0]
        wih_pad = wih_t if din == Dmax else jnp.pad(wih_t, ((0, Dmax - din), (0, 0)))
        wih_rows.append(wih_pad * gate_scale)
        whh_rows.append(whh_t * gate_scale)
        b_rows.append(bias * gate_scale)
    wih_stack = jnp.stack(wih_rows)    # (L, Dmax, 4H)
    whh_stack = jnp.stack(whh_rows)    # (L, H, 4H)
    b_stack = jnp.stack(b_rows)        # (L, 1, 4H)

    # Zero-pad batch to Bp and flatten the time/batch dims of x (done by XLA,
    # outside the kernel) so every in-kernel op is full-sublane and unmasked.
    if Bp != B:
        x_p = jnp.pad(x, ((0, 0), (0, Bp - B), (0, 0)))
        h0_p = jnp.pad(h0, ((0, 0), (0, Bp - B), (0, 0)))
        c0_p = jnp.pad(c0, ((0, 0), (0, Bp - B), (0, 0)))
    else:
        x_p, h0_p, c0_p = x, h0, c0
    x_flat = x_p.reshape(S * Bp, Din0)

    kernel = _make_fused_kernel(S, Bp, H, Din0, L, O)
    out, hN, cN = pl.pallas_call(
        kernel,
        out_shape=(jax.ShapeDtypeStruct((S, O), jnp.float32),
                   jax.ShapeDtypeStruct((L, Bp, H), jnp.float32),
                   jax.ShapeDtypeStruct((L, Bp, H), jnp.float32)),
        grid_spec=pltpu.PrefetchScalarGridSpec(
            num_scalar_prefetch=0,
            grid=(1,),
            in_specs=[
                pl.BlockSpec((S * Bp, Din0), lambda i: (0, 0)),      # x (flattened)
                pl.BlockSpec((L, Dmax, G), lambda i: (0, 0, 0)),     # W_ih^T stacked (padded)
                pl.BlockSpec((L, H, G), lambda i: (0, 0, 0)),        # W_hh^T stacked
                pl.BlockSpec((L, 1, G), lambda i: (0, 0, 0)),        # bias stacked
                pl.BlockSpec((L, Bp, H), lambda i: (0, 0, 0)),       # h0
                pl.BlockSpec((L, Bp, H), lambda i: (0, 0, 0)),       # c0
                pl.BlockSpec((H, O), lambda i: (0, 0)),              # W_lin^T
                pl.BlockSpec((1, O), lambda i: (0, 0)),              # b_lin
            ],
            out_specs=(
                pl.BlockSpec((S, O), lambda i: (0, 0)),              # out
                pl.BlockSpec((L, Bp, H), lambda i: (0, 0, 0)),       # h_n
                pl.BlockSpec((L, Bp, H), lambda i: (0, 0, 0)),       # c_n
            ),
            scratch_shapes=[pltpu.VMEM((S * Bp, H), jnp.float32)],   # per-layer outputs
        ),
        compiler_params=pltpu.CompilerParams(
            dimension_semantics=("arbitrary",)),
    )(x_flat, wih_stack, whh_stack, b_stack, h0_p, c0_p, w_lin_t, b_lin)
    return out, (hN[:, :B], cN[:, :B])


# ------------------------------ Pure JAX reference -----------------------------

def reference_forward(x, hidden, layer_params, w_lin_t, b_lin):
    h0, c0 = hidden
    layer_in = x
    hs, cs = [], []
    for l, (wih_t, whh_t, bias) in enumerate(layer_params):
        H = h0.shape[-1]
        h, c = h0[l], c0[l]
        ys = []
        for t in range(x.shape[0]):
            gates = layer_in[t] @ wih_t + h @ whh_t + bias[0]
            i_g = jax.nn.sigmoid(gates[:, 0 * H:1 * H])
            f_g = jax.nn.sigmoid(gates[:, 1 * H:2 * H])
            g_g = jnp.tanh(gates[:, 2 * H:3 * H])
            o_g = jax.nn.sigmoid(gates[:, 3 * H:4 * H])
            c = f_g * c + i_g * g_g
            h = o_g * jnp.tanh(c)
            ys.append(h)
        layer_in = jnp.stack(ys)
        hs.append(h)
        cs.append(c)
    out = jax.nn.sigmoid((layer_in @ w_lin_t + b_lin[0])[:, 0])
    return out, (jnp.stack(hs), jnp.stack(cs))


# ------------------------------------ Main -------------------------------------

if __name__ == "__main__":
    # Module hyperparameters (small, consistent with the forward()).
    input_size, hidden_size, batch_size = 16, 32, 2
    output_size, num_layers, seq_len = 4, 2, 8

    key = jax.random.PRNGKey(0)
    k_bound = 1.0 / math.sqrt(hidden_size)

    # Deterministic parameter init (PyTorch-style uniform), stored transposed.
    layer_params = []
    for l in range(num_layers):
        in_dim = input_size if l == 0 else hidden_size
        key, k1, k2, k3, k4 = jax.random.split(key, 5)
        wih_t = jax.random.uniform(k1, (in_dim, 4 * hidden_size), jnp.float32,
                                   -k_bound, k_bound)
        whh_t = jax.random.uniform(k2, (hidden_size, 4 * hidden_size), jnp.float32,
                                   -k_bound, k_bound)
        b_ih = jax.random.uniform(k3, (1, 4 * hidden_size), jnp.float32, -k_bound, k_bound)
        b_hh = jax.random.uniform(k4, (1, 4 * hidden_size), jnp.float32, -k_bound, k_bound)
        layer_params.append((wih_t, whh_t, b_ih + b_hh))

    key, k5, k6 = jax.random.split(key, 3)
    lin_bound = 1.0 / math.sqrt(hidden_size)
    w_lin_t = jax.random.uniform(k5, (hidden_size, output_size), jnp.float32,
                                 -lin_bound, lin_bound)
    b_lin = jax.random.uniform(k6, (1, output_size), jnp.float32, -lin_bound, lin_bound)

    # Inputs: (seq, batch, input_size) and hidden = (h0, c0).
    key, kx, kh, kc = jax.random.split(key, 4)
    x = jax.random.normal(kx, (seq_len, batch_size, input_size), jnp.float32)
    h0 = jax.random.normal(kh, (num_layers, batch_size, hidden_size), jnp.float32)
    c0 = jax.random.normal(kc, (num_layers, batch_size, hidden_size), jnp.float32)

    out, (hN, cN) = lstm_for_bceloss_hidden_forward(x, (h0, c0), layer_params,
                                                    w_lin_t, b_lin)
    jax.block_until_ready((out, hN, cN))

    out_ref, (hN_ref, cN_ref) = reference_forward(x, (h0, c0), layer_params,
                                                  w_lin_t, b_lin)
    assert out.shape == (seq_len, output_size)
    assert hN.shape == (num_layers, batch_size, hidden_size)
    assert cN.shape == (num_layers, batch_size, hidden_size)
    assert jnp.allclose(out, out_ref, atol=1e-4, rtol=1e-4)
    assert jnp.allclose(hN, hN_ref, atol=1e-4, rtol=1e-4)
    assert jnp.allclose(cN, cN_ref, atol=1e-4, rtol=1e-4)

    print("KERNEL_OK")
</pallas_src>

<mosaic_0001>
module attributes {stable_mosaic.version = 11 : i64} {
  func.func @kernel(%arg0: i32, %arg1: memref<64x16xf32, #tpu.memory_space<vmem>>, %arg2: memref<2x32x128xf32, #tpu.memory_space<vmem>>, %arg3: memref<2x32x128xf32, #tpu.memory_space<vmem>>, %arg4: memref<2x1x128xf32, #tpu.memory_space<vmem>>, %arg5: memref<2x8x32xf32, #tpu.memory_space<vmem>>, %arg6: memref<2x8x32xf32, #tpu.memory_space<vmem>>, %arg7: memref<32x4xf32, #tpu.memory_space<vmem>>, %arg8: memref<1x4xf32, #tpu.memory_space<vmem>>, %arg9: memref<8x4xf32, #tpu.memory_space<vmem>>, %arg10: memref<2x8x32xf32, #tpu.memory_space<vmem>>, %arg11: memref<2x8x32xf32, #tpu.memory_space<vmem>>, %arg12: memref<64x32xf32, #tpu.memory_space<vmem>>) attributes {dimension_semantics = [#tpu.dimension_semantics<arbitrary>], iteration_bounds = array<i64: 1>, scalar_prefetch = 0 : i64, scratch_operands = 1 : i64, tpu.core_type = #tpu.core_type<tc>, window_params = [{pipeline_mode = #tpu.pipeline_mode<synchronous>, transform_indices = @transform_0, window_bounds = array<i64: 64, 16>}, {pipeline_mode = #tpu.pipeline_mode<synchronous>, transform_indices = @transform_1, window_bounds = array<i64: 2, 32, 128>}, {pipeline_mode = #tpu.pipeline_mode<synchronous>, transform_indices = @transform_2, window_bounds = array<i64: 2, 32, 128>}, {pipeline_mode = #tpu.pipeline_mode<synchronous>, transform_indices = @transform_3, window_bounds = array<i64: 2, 1, 128>}, {pipeline_mode = #tpu.pipeline_mode<synchronous>, transform_indices = @transform_4, window_bounds = array<i64: 2, 8, 32>}, {pipeline_mode = #tpu.pipeline_mode<synchronous>, transform_indices = @transform_5, window_bounds = array<i64: 2, 8, 32>}, {pipeline_mode = #tpu.pipeline_mode<synchronous>, transform_indices = @transform_6, window_bounds = array<i64: 32, 4>}, {pipeline_mode = #tpu.pipeline_mode<synchronous>, transform_indices = @transform_7, window_bounds = array<i64: 1, 4>}, {pipeline_mode = #tpu.pipeline_mode<synchronous>, transform_indices = @transform_8, window_bounds = array<i64: 8, 4>}, {pipeline_mode = #tpu.pipeline_mode<synchronous>, transform_indices = @transform_9, window_bounds = array<i64: 2, 8, 32>}, {pipeline_mode = #tpu.pipeline_mode<synchronous>, transform_indices = @transform_10, window_bounds = array<i64: 2, 8, 32>}]} {
    %0 = tpu.iota {dimensions = array<i32: 1>} : vector<8x128xi32>
    %c64_i32 = arith.constant 64 : i32
    %1 = vector.broadcast %c64_i32 : i32 to vector<8x128xi32>
    %2 = arith.cmpi sge, %0, %1 : vector<8x128xi32>
    %c96_i32 = arith.constant 96 : i32
    %3 = vector.broadcast %c96_i32 : i32 to vector<8x128xi32>
    %4 = arith.cmpi slt, %0, %3 : vector<8x128xi32>
    %5 = arith.andi %2, %4 : vector<8x128xi1>
    %c0 = arith.constant 0 : index
    %c0_0 = arith.constant 0 : index
    %6 = vector.load %arg1[%c0, %c0_0] : memref<64x16xf32, #tpu.memory_space<vmem>>, vector<64x16xf32>
    %c0_1 = arith.constant 0 : index
    %c0_2 = arith.constant 0 : index
    %c0_3 = arith.constant 0 : index
    %7 = vector.load %arg3[%c0_1, %c0_2, %c0_3] : memref<2x32x128xf32, #tpu.memory_space<vmem>>, vector<1x32x128xf32>
    %8 = vector.shape_cast %7 : vector<1x32x128xf32> to vector<32x128xf32>
    %c0_4 = arith.constant 0 : index
    %c0_5 = arith.constant 0 : index
    %c0_6 = arith.constant 0 : index
    %9 = vector.load %arg2[%c0_4, %c0_5, %c0_6] : memref<2x32x128xf32, #tpu.memory_space<vmem>>, vector<1x16x128xf32>
    %10 = vector.shape_cast %9 : vector<1x16x128xf32> to vector<16x128xf32>
    %cst = arith.constant dense<0.000000e+00> : vector<64x128xf32>
    %11 = tpu.matmul %6, %10, %cst {dimension_numbers = #tpu.dot_dimension_numbers<[1], [0], [0], [1], [0, 0, 1, 1], [], []>} : vector<64x16xf32>, vector<16x128xf32>, vector<64x128xf32> -> vector<64x128xf32>
    %c0_7 = arith.constant 0 : index
    %c0_8 = arith.constant 0 : index
    %c0_9 = arith.constant 0 : index
    %12 = vector.load %arg4[%c0_7, %c0_8, %c0_9] : memref<2x1x128xf32, #tpu.memory_space<vmem>>, vector<1x1x128xf32>
    %13 = vector.shape_cast %12 : vector<1x1x128xf32> to vector<1x128xf32>
    %14 = vector.broadcast %13 : vector<1x128xf32> to vector<64x128xf32>
    %15 = arith.addf %11, %14 : vector<64x128xf32>
    %c0_10 = arith.constant 0 : index
    %c0_11 = arith.constant 0 : index
    %c0_12 = arith.constant 0 : index
    %16 = vector.load %arg5[%c0_10, %c0_11, %c0_12] : memref<2x8x32xf32, #tpu.memory_space<vmem>>, vector<1x8x32xf32>
    %17 = vector.shape_cast %16 : vector<1x8x32xf32> to vector<8x32xf32>
    %c0_13 = arith.constant 0 : index
    %c0_14 = arith.constant 0 : index
    %c0_15 = arith.constant 0 : index
    %18 = vector.load %arg6[%c0_13, %c0_14, %c0_15] : memref<2x8x32xf32, #tpu.memory_space<vmem>>, vector<1x8x32xf32>
    %19 = vector.shape_cast %18 : vector<1x8x32xf32> to vector<8x32xf32>
    %cst_16 = arith.constant dense<0.000000e+00> : vector<8x128xf32>
    %20 = tpu.matmul %17, %8, %cst_16 {dimension_numbers = #tpu.dot_dimension_numbers<[1], [0], [0], [1], [0, 0, 1, 1], [], []>} : vector<8x32xf32>, vector<32x128xf32>, vector<8x128xf32> -> vector<8x128xf32>
    %21 = vector.extract_strided_slice %15 {offsets = [0, 0], sizes = [8, 128], strides = [1, 1]} : vector<64x128xf32> to vector<8x128xf32>
    %22 = arith.addf %20, %21 : vector<8x128xf32>
    %23 = math.tanh %22 : vector<8x128xf32>
    %cst_17 = arith.constant 5.000000e-01 : f32
    %24 = vector.broadcast %cst_17 : f32 to vector<8x128xf32>
    %25 = arith.mulf %24, %23 : vector<8x128xf32>
    %cst_18 = arith.constant 5.000000e-01 : f32
    %26 = vector.broadcast %cst_18 : f32 to vector<8x128xf32>
    %27 = arith.addf %25, %26 : vector<8x128xf32>
    %28 = arith.select %5, %23, %27 : vector<8x128xi1>, vector<8x128xf32>
    %29 = vector.extract_strided_slice %28 {offsets = [0, 0], sizes = [8, 32], strides = [1, 1]} : vector<8x128xf32> to vector<8x32xf32>
    %30 = vector.extract_strided_slice %28 {offsets = [0, 32], sizes = [8, 32], strides = [1, 1]} : vector<8x128xf32> to vector<8x32xf32>
    %31 = vector.extract_strided_slice %28 {offsets = [0, 64], sizes = [8, 32], strides = [1, 1]} : vector<8x128xf32> to vector<8x32xf32>
    %32 = vector.extract_strided_slice %28 {offsets = [0, 96], sizes = [8, 32], strides = [1, 1]} : vector<8x128xf32> to vector<8x32xf32>
    %33 = arith.mulf %30, %19 : vector<8x32xf32>
    %34 = arith.mulf %29, %31 : vector<8x32xf32>
    %35 = arith.addf %33, %34 : vector<8x32xf32>
    %36 = math.tanh %35 : vector<8x32xf32>
    %37 = arith.mulf %32, %36 : vector<8x32xf32>
    %c0_19 = arith.constant 0 : index
    %c0_20 = arith.constant 0 : index
    %38 = vector.load %arg12[%c0_19, %c0_20] : memref<64x32xf32, #tpu.memory_space<vmem>>, vector<8x32xf32>
    tpu.vector_store %arg12[%c0_19, %c0_20], %37 {strides = array<i32>} : memref<64x32xf32, #tpu.memory_space<vmem>>, vector<8x32xf32>,
    %cst_21 = arith.constant dense<0.000000e+00> : vector<8x128xf32>
    %39 = tpu.matmul %37, %8, %cst_21 {dimension_numbers = #tpu.dot_dimension_numbers<[1], [0], [0], [1], [0, 0, 1, 1], [], []>} : vector<8x32xf32>, vector<32x128xf32>, vector<8x128xf32> -> vector<8x128xf32>
    %40 = vector.extract_strided_slice %15 {offsets = [8, 0], sizes = [8, 128], strides = [1, 1]} : vector<64x128xf32> to vector<8x128xf32>
    %41 = arith.addf %39, %40 : vector<8x128xf32>
    %42 = math.tanh %41 : vector<8x128xf32>
    %cst_22 = arith.constant 5.000000e-01 : f32
    %43 = vector.broadcast %cst_22 : f32 to vector<8x128xf32>
    %44 = arith.mulf %43, %42 : vector<8x128xf32>
    %cst_23 = arith.constant 5.000000e-01 : f32
    %45 = vector.broadcast %cst_23 : f32 to vector<8x128xf32>
    %46 = arith.addf %44, %45 : vector<8x128xf32>
    %47 = arith.select %5, %42, %46 : vector<8x128xi1>, vector<8x128xf32>
    %48 = vector.extract_strided_slice %47 {offsets = [0, 0], sizes = [8, 32], strides = [1, 1]} : vector<8x128xf32> to vector<8x32xf32>
    %49 = vector.extract_strided_slice %47 {offsets = [0, 32], sizes = [8, 32], strides = [1, 1]} : vector<8x128xf32> to vector<8x32xf32>
    %50 = vector.extract_strided_slice %47 {offsets = [0, 64], sizes = [8, 32], strides = [1, 1]} : vector<8x128xf32> to vector<8x32xf32>
    %51 = vector.extract_strided_slice %47 {offsets = [0, 96], sizes = [8, 32], strides = [1, 1]} : vector<8x128xf32> to vector<8x32xf32>
    %52 = arith.mulf %49, %35 : vector<8x32xf32>
    %53 = arith.mulf %48, %50 : vector<8x32xf32>
    %54 = arith.addf %52, %53 : vector<8x32xf32>
    %55 = math.tanh %54 : vector<8x32xf32>
    %56 = arith.mulf %51, %55 : vector<8x32xf32>
    %c8 = arith.constant 8 : index
    %c0_24 = arith.constant 0 : index
    %57 = vector.load %arg12[%c8, %c0_24] : memref<64x32xf32, #tpu.memory_space<vmem>>, vector<8x32xf32>
    tpu.vector_store %arg12[%c8, %c0_24], %56 {strides = array<i32>} : memref<64x32xf32, #tpu.memory_space<vmem>>, vector<8x32xf32>,
    %cst_25 = arith.constant dense<0.000000e+00> : vector<8x128xf32>
    %58 = tpu.matmul %56, %8, %cst_25 {dimension_numbers = #tpu.dot_dimension_numbers<[1], [0], [0], [1], [0, 0, 1, 1], [], []>} : vector<8x32xf32>, vector<32x128xf32>, vector<8x128xf32> -> vector<8x128xf32>
    %59 = vector.extract_strided_slice %15 {offsets = [16, 0], sizes = [8, 128], strides = [1, 1]} : vector<64x128xf32> to vector<8x128xf32>
    %60 = arith.addf %58, %59 : vector<8x128xf32>
    %61 = math.tanh %60 : vector<8x128xf32>
    %cst_26 = arith.constant 5.000000e-01 : f32
    %62 = vector.broadcast %cst_26 : f32 to vector<8x128xf32>
    %63 = arith.mulf %62, %61 : vector<8x128xf32>
    %cst_27 = arith.constant 5.000000e-01 : f32
    %64 = vector.broadcast %cst_27 : f32 to vector<8x128xf32>
    %65 = arith.addf %63, %64 : vector<8x128xf32>
    %66 = arith.select %5, %61, %65 : vector<8x128xi1>, vector<8x128xf32>
    %67 = vector.extract_strided_slice %66 {offsets = [0, 0], sizes = [8, 32], strides = [1, 1]} : vector<8x128xf32> to vector<8x32xf32>
    %68 = vector.extract_strided_slice %66 {offsets = [0, 32], sizes = [8, 32], strides = [1, 1]} : vector<8x128xf32> to vector<8x32xf32>
    %69 = vector.extract_strided_slice %66 {offsets = [0, 64], sizes = [8, 32], strides = [1, 1]} : vector<8x128xf32> to vector<8x32xf32>
    %70 = vector.extract_strided_slice %66 {offsets = [0, 96], sizes = [8, 32], strides = [1, 1]} : vector<8x128xf32> to vector<8x32xf32>
    %71 = arith.mulf %68, %54 : vector<8x32xf32>
    %72 = arith.mulf %67, %69 : vector<8x32xf32>
    %73 = arith.addf %71, %72 : vector<8x32xf32>
    %74 = math.tanh %73 : vector<8x32xf32>
    %75 = arith.mulf %70, %74 : vector<8x32xf32>
    %c16 = arith.constant 16 : index
    %c0_28 = arith.constant 0 : index
    %76 = vector.load %arg12[%c16, %c0_28] : memref<64x32xf32, #tpu.memory_space<vmem>>, vector<8x32xf32>
    tpu.vector_store %arg12[%c16, %c0_28], %75 {strides = array<i32>} : memref<64x32xf32, #tpu.memory_space<vmem>>, vector<8x32xf32>,
    %cst_29 = arith.constant dense<0.000000e+00> : vector<8x128xf32>
    %77 = tpu.matmul %75, %8, %cst_29 {dimension_numbers = #tpu.dot_dimension_numbers<[1], [0], [0], [1], [0, 0, 1, 1], [], []>} : vector<8x32xf32>, vector<32x128xf32>, vector<8x128xf32> -> vector<8x128xf32>
    %78 = vector.extract_strided_slice %15 {offsets = [24, 0], sizes = [8, 128], strides = [1, 1]} : vector<64x128xf32> to vector<8x128xf32>
    %79 = arith.addf %77, %78 : vector<8x128xf32>
    %80 = math.tanh %79 : vector<8x128xf32>
    %cst_30 = arith.constant 5.000000e-01 : f32
    %81 = vector.broadcast %cst_30 : f32 to vector<8x128xf32>
    %82 = arith.mulf %81, %80 : vector<8x128xf32>
    %cst_31 = arith.constant 5.000000e-01 : f32
    %83 = vector.broadcast %cst_31 : f32 to vector<8x128xf32>
    %84 = arith.addf %82, %83 : vector<8x128xf32>
    %85 = arith.select %5, %80, %84 : vector<8x128xi1>, vector<8x128xf32>
    %86 = vector.extract_strided_slice %85 {offsets = [0, 0], sizes = [8, 32], strides = [1, 1]} : vector<8x128xf32> to vector<8x32xf32>
    %87 = vector.extract_strided_slice %85 {offsets = [0, 32], sizes = [8, 32], strides = [1, 1]} : vector<8x128xf32> to vector<8x32xf32>
    %88 = vector.extract_strided_slice %85 {offsets = [0, 64], sizes = [8, 32], strides = [1, 1]} : vector<8x128xf32> to vector<8x32xf32>
    %89 = vector.extract_strided_slice %85 {offsets = [0, 96], sizes = [8, 32], strides = [1, 1]} : vector<8x128xf32> to vector<8x32xf32>
    %90 = arith.mulf %87, %73 : vector<8x32xf32>
    %91 = arith.mulf %86, %88 : vector<8x32xf32>
    %92 = arith.addf %90, %91 : vector<8x32xf32>
    %93 = math.tanh %92 : vector<8x32xf32>
    %94 = arith.mulf %89, %93 : vector<8x32xf32>
    %c24 = arith.constant 24 : index
    %c0_32 = arith.constant 0 : index
    %95 = vector.load %arg12[%c24, %c0_32] : memref<64x32xf32, #tpu.memory_space<vmem>>, vector<8x32xf32>
    tpu.vector_store %arg12[%c24, %c0_32], %94 {strides = array<i32>} : memref<64x32xf32, #tpu.memory_space<vmem>>, vector<8x32xf32>,
    %cst_33 = arith.constant dense<0.000000e+00> : vector<8x128xf32>
    %96 = tpu.matmul %94, %8, %cst_33 {dimension_numbers = #tpu.dot_dimension_numbers<[1], [0], [0], [1], [0, 0, 1, 1], [], []>} : vector<8x32xf32>, vector<32x128xf32>, vector<8x128xf32> -> vector<8x128xf32>
    %97 = vector.extract_strided_slice %15 {offsets = [32, 0], sizes = [8, 128], strides = [1, 1]} : vector<64x128xf32> to vector<8x128xf32>
    %98 = arith.addf %96, %97 : vector<8x128xf32>
    %99 = math.tanh %98 : vector<8x128xf32>
    %cst_34 = arith.constant 5.000000e-01 : f32
    %100 = vector.broadcast %cst_34 : f32 to vector<8x128xf32>
    %101 = arith.mulf %100, %99 : vector<8x128xf32>
    %cst_35 = arith.constant 5.000000e-01 : f32
    %102 = vector.broadcast %cst_35 : f32 to vector<8x128xf32>
    %103 = arith.addf %101, %102 : vector<8x128xf32>
    %104 = arith.select %5, %99, %103 : vector<8x128xi1>, vector<8x128xf32>
    %105 = vector.extract_strided_slice %104 {offsets = [0, 0], sizes = [8, 32], strides = [1, 1]} : vector<8x128xf32> to vector<8x32xf32>
    %106 = vector.extract_strided_slice %104 {offsets = [0, 32], sizes = [8, 32], strides = [1, 1]} : vector<8x128xf32> to vector<8x32xf32>
    %107 = vector.extract_strided_slice %104 {offsets = [0, 64], sizes = [8, 32], strides = [1, 1]} : vector<8x128xf32> to vector<8x32xf32>
    %108 = vector.extract_strided_slice %104 {offsets = [0, 96], sizes = [8, 32], strides = [1, 1]} : vector<8x128xf32> to vector<8x32xf32>
    %109 = arith.mulf %106, %92 : vector<8x32xf32>
    %110 = arith.mulf %105, %107 : vector<8x32xf32>
    %111 = arith.addf %109, %110 : vector<8x32xf32>
    %112 = math.tanh %111 : vector<8x32xf32>
    %113 = arith.mulf %108, %112 : vector<8x32xf32>
    %c32 = arith.constant 32 : index
    %c0_36 = arith.constant 0 : index
    %114 = vector.load %arg12[%c32, %c0_36] : memref<64x32xf32, #tpu.memory_space<vmem>>, vector<8x32xf32>
    tpu.vector_store %arg12[%c32, %c0_36], %113 {strides = array<i32>} : memref<64x32xf32, #tpu.memory_space<vmem>>, vector<8x32xf32>,
    %cst_37 = arith.constant dense<0.000000e+00> : vector<8x128xf32>
    %115 = tpu.matmul %113, %8, %cst_37 {dimension_numbers = #tpu.dot_dimension_numbers<[1], [0], [0], [1], [0, 0, 1, 1], [], []>} : vector<8x32xf32>, vector<32x128xf32>, vector<8x128xf32> -> vector<8x128xf32>
    %116 = vector.extract_strided_slice %15 {offsets = [40, 0], sizes = [8, 128], strides = [1, 1]} : vector<64x128xf32> to vector<8x128xf32>
    %117 = arith.addf %115, %116 : vector<8x128xf32>
    %118 = math.tanh %117 : vector<8x128xf32>
    %cst_38 = arith.constant 5.000000e-01 : f32
    %119 = vector.broadcast %cst_38 : f32 to vector<8x128xf32>
    %120 = arith.mulf %119, %118 : vector<8x128xf32>
    %cst_39 = arith.constant 5.000000e-01 : f32
    %121 = vector.broadcast %cst_39 : f32 to vector<8x128xf32>
    %122 = arith.addf %120, %121 : vector<8x128xf32>
    %123 = arith.select %5, %118, %122 : vector<8x128xi1>, vector<8x128xf32>
    %124 = vector.extract_strided_slice %123 {offsets = [0, 0], sizes = [8, 32], strides = [1, 1]} : vector<8x128xf32> to vector<8x32xf32>
    %125 = vector.extract_strided_slice %123 {offsets = [0, 32], sizes = [8, 32], strides = [1, 1]} : vector<8x128xf32> to vector<8x32xf32>
    %126 = vector.extract_strided_slice %123 {offsets = [0, 64], sizes = [8, 32], strides = [1, 1]} : vector<8x128xf32> to vector<8x32xf32>
    %127 = vector.extract_strided_slice %123 {offsets = [0, 96], sizes = [8, 32], strides = [1, 1]} : vector<8x128xf32> to vector<8x32xf32>
    %128 = arith.mulf %125, %111 : vector<8x32xf32>
    %129 = arith.mulf %124, %126 : vector<8x32xf32>
    %130 = arith.addf %128, %129 : vector<8x32xf32>
    %131 = math.tanh %130 : vector<8x32xf32>
    %132 = arith.mulf %127, %131 : vector<8x32xf32>
    %c40 = arith.constant 40 : index
    %c0_40 = arith.constant 0 : index
    %133 = vector.load %arg12[%c40, %c0_40] : memref<64x32xf32, #tpu.memory_space<vmem>>, vector<8x32xf32>
    tpu.vector_store %arg12[%c40, %c0_40], %132 {strides = array<i32>} : memref<64x32xf32, #tpu.memory_space<vmem>>, vector<8x32xf32>,
    %cst_41 = arith.constant dense<0.000000e+00> : vector<8x128xf32>
    %134 = tpu.matmul %132, %8, %cst_41 {dimension_numbers = #tpu.dot_dimension_numbers<[1], [0], [0], [1], [0, 0, 1, 1], [], []>} : vector<8x32xf32>, vector<32x128xf32>, vector<8x128xf32> -> vector<8x128xf32>
    %135 = vector.extract_strided_slice %15 {offsets = [48, 0], sizes = [8, 128], strides = [1, 1]} : vector<64x128xf32> to vector<8x128xf32>
    %136 = arith.addf %134, %135 : vector<8x128xf32>
    %137 = math.tanh %136 : vector<8x128xf32>
    %cst_42 = arith.constant 5.000000e-01 : f32
    %138 = vector.broadcast %cst_42 : f32 to vector<8x128xf32>
    %139 = arith.mulf %138, %137 : vector<8x128xf32>
    %cst_43 = arith.constant 5.000000e-01 : f32
    %140 = vector.broadcast %cst_43 : f32 to vector<8x128xf32>
    %141 = arith.addf %139, %140 : vector<8x128xf32>
    %142 = arith.select %5, %137, %141 : vector<8x128xi1>, vector<8x128xf32>
    %143 = vector.extract_strided_slice %142 {offsets = [0, 0], sizes = [8, 32], strides = [1, 1]} : vector<8x128xf32> to vector<8x32xf32>
    %144 = vector.extract_strided_slice %142 {offsets = [0, 32], sizes = [8, 32], strides = [1, 1]} : vector<8x128xf32> to vector<8x32xf32>
    %145 = vector.extract_strided_slice %142 {offsets = [0, 64], sizes = [8, 32], strides = [1, 1]} : vector<8x128xf32> to vector<8x32xf32>
    %146 = vector.extract_strided_slice %142 {offsets = [0, 96], sizes = [8, 32], strides = [1, 1]} : vector<8x128xf32> to vector<8x32xf32>
    %147 = arith.mulf %144, %130 : vector<8x32xf32>
    %148 = arith.mulf %143, %145 : vector<8x32xf32>
    %149 = arith.addf %147, %148 : vector<8x32xf32>
    %150 = math.tanh %149 : vector<8x32xf32>
    %151 = arith.mulf %146, %150 : vector<8x32xf32>
    %c48 = arith.constant 48 : index
    %c0_44 = arith.constant 0 : index
    %152 = vector.load %arg12[%c48, %c0_44] : memref<64x32xf32, #tpu.memory_space<vmem>>, vector<8x32xf32>
    tpu.vector_store %arg12[%c48, %c0_44], %151 {strides = array<i32>} : memref<64x32xf32, #tpu.memory_space<vmem>>, vector<8x32xf32>,
    %cst_45 = arith.constant dense<0.000000e+00> : vector<8x128xf32>
    %153 = tpu.matmul %151, %8, %cst_45 {dimension_numbers = #tpu.dot_dimension_numbers<[1], [0], [0], [1], [0, 0, 1, 1], [], []>} : vector<8x32xf32>, vector<32x128xf32>, vector<8x128xf32> -> vector<8x128xf32>
    %154 = vector.extract_strided_slice %15 {offsets = [56, 0], sizes = [8, 128], strides = [1, 1]} : vector<64x128xf32> to vector<8x128xf32>
    %155 = arith.addf %153, %154 : vector<8x128xf32>
    %156 = math.tanh %155 : vector<8x128xf32>
    %cst_46 = arith.constant 5.000000e-01 : f32
    %157 = vector.broadcast %cst_46 : f32 to vector<8x128xf32>
    %158 = arith.mulf %157, %156 : vector<8x128xf32>
    %cst_47 = arith.constant 5.000000e-01 : f32
    %159 = vector.broadcast %cst_47 : f32 to vector<8x128xf32>
    %160 = arith.addf %158, %159 : vector<8x128xf32>
    %161 = arith.select %5, %156, %160 : vector<8x128xi1>, vector<8x128xf32>
    %162 = vector.extract_strided_slice %161 {offsets = [0, 0], sizes = [8, 32], strides = [1, 1]} : vector<8x128xf32> to vector<8x32xf32>
    %163 = vector.extract_strided_slice %161 {offsets = [0, 32], sizes = [8, 32], strides = [1, 1]} : vector<8x128xf32> to vector<8x32xf32>
    %164 = vector.extract_strided_slice %161 {offsets = [0, 64], sizes = [8, 32], strides = [1, 1]} : vector<8x128xf32> to vector<8x32xf32>
    %165 = vector.extract_strided_slice %161 {offsets = [0, 96], sizes = [8, 32], strides = [1, 1]} : vector<8x128xf32> to vector<8x32xf32>
    %166 = arith.mulf %163, %149 : vector<8x32xf32>
    %167 = arith.mulf %162, %164 : vector<8x32xf32>
    %168 = arith.addf %166, %167 : vector<8x32xf32>
    %169 = math.tanh %168 : vector<8x32xf32>
    %170 = arith.mulf %165, %169 : vector<8x32xf32>
    %c56 = arith.constant 56 : index
    %c0_48 = arith.constant 0 : index
    %171 = vector.load %arg12[%c56, %c0_48] : memref<64x32xf32, #tpu.memory_space<vmem>>, vector<8x32xf32>
    tpu.vector_store %arg12[%c56, %c0_48], %170 {strides = array<i32>} : memref<64x32xf32, #tpu.memory_space<vmem>>, vector<8x32xf32>,
    %c0_49 = arith.constant 0 : index
    %c0_50 = arith.constant 0 : index
    %c0_51 = arith.constant 0 : index
    %172 = vector.load %arg10[%c0_49, %c0_50, %c0_51] : memref<2x8x32xf32, #tpu.memory_space<vmem>>, vector<1x8x32xf32>
    %173 = vector.shape_cast %172 : vector<1x8x32xf32> to vector<8x32xf32>
    %174 = vector.shape_cast %170 : vector<8x32xf32> to vector<1x8x32xf32>
    tpu.vector_store %arg10[%c0_49, %c0_50, %c0_51], %174 {strides = array<i32>} : memref<2x8x32xf32, #tpu.memory_space<vmem>>, vector<1x8x32xf32>,
    %c0_52 = arith.constant 0 : index
    %c0_53 = arith.constant 0 : index
    %c0_54 = arith.constant 0 : index
    %175 = vector.load %arg11[%c0_52, %c0_53, %c0_54] : memref<2x8x32xf32, #tpu.memory_space<vmem>>, vector<1x8x32xf32>
    %176 = vector.shape_cast %175 : vector<1x8x32xf32> to vector<8x32xf32>
    %177 = vector.shape_cast %168 : vector<8x32xf32> to vector<1x8x32xf32>
    tpu.vector_store %arg11[%c0_52, %c0_53, %c0_54], %177 {strides = array<i32>} : memref<2x8x32xf32, #tpu.memory_space<vmem>>, vector<1x8x32xf32>,
    %c0_55 = arith.constant 0 : index
    %c0_56 = arith.constant 0 : index
    %178 = vector.load %arg12[%c0_55, %c0_56] : memref<64x32xf32, #tpu.memory_space<vmem>>, vector<64x32xf32>
    %c1 = arith.constant 1 : index
    %c0_57 = arith.constant 0 : index
    %c0_58 = arith.constant 0 : index
    %179 = vector.load %arg3[%c1, %c0_57, %c0_58] : memref<2x32x128xf32, #tpu.memory_space<vmem>>, vector<1x32x128xf32>
    %180 = vector.shape_cast %179 : vector<1x32x128xf32> to vector<32x128xf32>
    %c1_59 = arith.constant 1 : index
    %c0_60 = arith.constant 0 : index
    %c0_61 = arith.constant 0 : index
    %181 = vector.load %arg2[%c1_59, %c0_60, %c0_61] : memref<2x32x128xf32, #tpu.memory_space<vmem>>, vector<1x32x128xf32>
    %182 = vector.shape_cast %181 : vector<1x32x128xf32> to vector<32x128xf32>
    %cst_62 = arith.constant dense<0.000000e+00> : vector<64x128xf32>
    %183 = tpu.matmul %178, %182, %cst_62 {dimension_numbers = #tpu.dot_dimension_numbers<[1], [0], [0], [1], [0, 0, 1, 1], [], []>} : vector<64x32xf32>, vector<32x128xf32>, vector<64x128xf32> -> vector<64x128xf32>
    %c1_63 = arith.constant 1 : index
    %c0_64 = arith.constant 0 : index
    %c0_65 = arith.constant 0 : index
    %184 = vector.load %arg4[%c1_63, %c0_64, %c0_65] : memref<2x1x128xf32, #tpu.memory_space<vmem>>, vector<1x1x128xf32>
    %185 = vector.shape_cast %184 : vector<1x1x128xf32> to vector<1x128xf32>
    %186 = vector.broadcast %185 : vector<1x128xf32> to vector<64x128xf32>
    %187 = arith.addf %183, %186 : vector<64x128xf32>
    %c1_66 = arith.constant 1 : index
    %c0_67 = arith.constant 0 : index
    %c0_68 = arith.constant 0 : index
    %188 = vector.load %arg5[%c1_66, %c0_67, %c0_68] : memref<2x8x32xf32, #tpu.memory_space<vmem>>, vector<1x8x32xf32>
    %189 = vector.shape_cast %188 : vector<1x8x32xf32> to vector<8x32xf32>
    %c1_69 = arith.constant 1 : index
    %c0_70 = arith.constant 0 : index
    %c0_71 = arith.constant 0 : index
    %190 = vector.load %arg6[%c1_69, %c0_70, %c0_71] : memref<2x8x32xf32, #tpu.memory_space<vmem>>, vector<1x8x32xf32>
    %191 = vector.shape_cast %190 : vector<1x8x32xf32> to vector<8x32xf32>
    %cst_72 = arith.constant dense<0.000000e+00> : vector<8x128xf32>
    %192 = tpu.matmul %189, %180, %cst_72 {dimension_numbers = #tpu.dot_dimension_numbers<[1], [0], [0], [1], [0, 0, 1, 1], [], []>} : vector<8x32xf32>, vector<32x128xf32>, vector<8x128xf32> -> vector<8x128xf32>
    %193 = vector.extract_strided_slice %187 {offsets = [0, 0], sizes = [8, 128], strides = [1, 1]} : vector<64x128xf32> to vector<8x128xf32>
    %194 = arith.addf %192, %193 : vector<8x128xf32>
    %195 = math.tanh %194 : vector<8x128xf32>
    %cst_73 = arith.constant 5.000000e-01 : f32
    %196 = vector.broadcast %cst_73 : f32 to vector<8x128xf32>
    %197 = arith.mulf %196, %195 : vector<8x128xf32>
    %cst_74 = arith.constant 5.000000e-01 : f32
    %198 = vector.broadcast %cst_74 : f32 to vector<8x128xf32>
    %199 = arith.addf %197, %198 : vector<8x128xf32>
    %200 = arith.select %5, %195, %199 : vector<8x128xi1>, vector<8x128xf32>
    %201 = vector.extract_strided_slice %200 {offsets = [0, 0], sizes = [8, 32], strides = [1, 1]} : vector<8x128xf32> to vector<8x32xf32>
    %202 = vector.extract_strided_slice %200 {offsets = [0, 32], sizes = [8, 32], strides = [1, 1]} : vector<8x128xf32> to vector<8x32xf32>
    %203 = vector.extract_strided_slice %200 {offsets = [0, 64], sizes = [8, 32], strides = [1, 1]} : vector<8x128xf32> to vector<8x32xf32>
    %204 = vector.extract_strided_slice %200 {offsets = [0, 96], sizes = [8, 32], strides = [1, 1]} : vector<8x128xf32> to vector<8x32xf32>
    %205 = arith.mulf %202, %191 : vector<8x32xf32>
    %206 = arith.mulf %201, %203 : vector<8x32xf32>
    %207 = arith.addf %205, %206 : vector<8x32xf32>
    %208 = math.tanh %207 : vector<8x32xf32>
    %209 = arith.mulf %204, %208 : vector<8x32xf32>
    %c0_75 = arith.constant 0 : index
    %c0_76 = arith.constant 0 : index
    %210 = vector.load %arg12[%c0_75, %c0_76] : memref<64x32xf32, #tpu.memory_space<vmem>>, vector<8x32xf32>
    tpu.vector_store %arg12[%c0_75, %c0_76], %209 {strides = array<i32>} : memref<64x32xf32, #tpu.memory_space<vmem>>, vector<8x32xf32>,
    %cst_77 = arith.constant dense<0.000000e+00> : vector<8x128xf32>
    %211 = tpu.matmul %209, %180, %cst_77 {dimension_numbers = #tpu.dot_dimension_numbers<[1], [0], [0], [1], [0, 0, 1, 1], [], []>} : vector<8x32xf32>, vector<32x128xf32>, vector<8x128xf32> -> vector<8x128xf32>
    %212 = vector.extract_strided_slice %187 {offsets = [8, 0], sizes = [8, 128], strides = [1, 1]} : vector<64x128xf32> to vector<8x128xf32>
    %213 = arith.addf %211, %212 : vector<8x128xf32>
    %214 = math.tanh %213 : vector<8x128xf32>
    %cst_78 = arith.constant 5.000000e-01 : f32
    %215 = vector.broadcast %cst_78 : f32 to vector<8x128xf32>
    %216 = arith.mulf %215, %214 : vector<8x128xf32>
    %cst_79 = arith.constant 5.000000e-01 : f32
    %217 = vector.broadcast %cst_79 : f32 to vector<8x128xf32>
    %218 = arith.addf %216, %217 : vector<8x128xf32>
    %219 = arith.select %5, %214, %218 : vector<8x128xi1>, vector<8x128xf32>
    %220 = vector.extract_strided_slice %219 {offsets = [0, 0], sizes = [8, 32], strides = [1, 1]} : vector<8x128xf32> to vector<8x32xf32>
    %221 = vector.extract_strided_slice %219 {offsets = [0, 32], sizes = [8, 32], strides = [1, 1]} : vector<8x128xf32> to vector<8x32xf32>
    %222 = vector.extract_strided_slice %219 {offsets = [0, 64], sizes = [8, 32], strides = [1, 1]} : vector<8x128xf32> to vector<8x32xf32>
    %223 = vector.extract_strided_slice %219 {offsets = [0, 96], sizes = [8, 32], strides = [1, 1]} : vector<8x128xf32> to vector<8x32xf32>
    %224 = arith.mulf %221, %207 : vector<8x32xf32>
    %225 = arith.mulf %220, %222 : vector<8x32xf32>
    %226 = arith.addf %224, %225 : vector<8x32xf32>
    %227 = math.tanh %226 : vector<8x32xf32>
    %228 = arith.mulf %223, %227 : vector<8x32xf32>
    %c8_80 = arith.constant 8 : index
    %c0_81 = arith.constant 0 : index
    %229 = vector.load %arg12[%c8_80, %c0_81] : memref<64x32xf32, #tpu.memory_space<vmem>>, vector<8x32xf32>
    tpu.vector_store %arg12[%c8_80, %c0_81], %228 {strides = array<i32>} : memref<64x32xf32, #tpu.memory_space<vmem>>, vector<8x32xf32>,
    %cst_82 = arith.constant dense<0.000000e+00> : vector<8x128xf32>
    %230 = tpu.matmul %228, %180, %cst_82 {dimension_numbers = #tpu.dot_dimension_numbers<[1], [0], [0], [1], [0, 0, 1, 1], [], []>} : vector<8x32xf32>, vector<32x128xf32>, vector<8x128xf32> -> vector<8x128xf32>
    %231 = vector.extract_strided_slice %187 {offsets = [16, 0], sizes = [8, 128], strides = [1, 1]} : vector<64x128xf32> to vector<8x128xf32>
    %232 = arith.addf %230, %231 : vector<8x128xf32>
    %233 = math.tanh %232 : vector<8x128xf32>
    %cst_83 = arith.constant 5.000000e-01 : f32
    %234 = vector.broadcast %cst_83 : f32 to vector<8x128xf32>
    %235 = arith.mulf %234, %233 : vector<8x128xf32>
    %cst_84 = arith.constant 5.000000e-01 : f32
    %236 = vector.broadcast %cst_84 : f32 to vector<8x128xf32>
    %237 = arith.addf %235, %236 : vector<8x128xf32>
    %238 = arith.select %5, %233, %237 : vector<8x128xi1>, vector<8x128xf32>
    %239 = vector.extract_strided_slice %238 {offsets = [0, 0], sizes = [8, 32], strides = [1, 1]} : vector<8x128xf32> to vector<8x32xf32>
    %240 = vector.extract_strided_slice %238 {offsets = [0, 32], sizes = [8, 32], strides = [1, 1]} : vector<8x128xf32> to vector<8x32xf32>
    %241 = vector.extract_strided_slice %238 {offsets = [0, 64], sizes = [8, 32], strides = [1, 1]} : vector<8x128xf32> to vector<8x32xf32>
    %242 = vector.extract_strided_slice %238 {offsets = [0, 96], sizes = [8, 32], strides = [1, 1]} : vector<8x128xf32> to vector<8x32xf32>
    %243 = arith.mulf %240, %226 : vector<8x32xf32>
    %244 = arith.mulf %239, %241 : vector<8x32xf32>
    %245 = arith.addf %243, %244 : vector<8x32xf32>
    %246 = math.tanh %245 : vector<8x32xf32>
    %247 = arith.mulf %242, %246 : vector<8x32xf32>
    %c16_85 = arith.constant 16 : index
    %c0_86 = arith.constant 0 : index
    %248 = vector.load %arg12[%c16_85, %c0_86] : memref<64x32xf32, #tpu.memory_space<vmem>>, vector<8x32xf32>
    tpu.vector_store %arg12[%c16_85, %c0_86], %247 {strides = array<i32>} : memref<64x32xf32, #tpu.memory_space<vmem>>, vector<8x32xf32>,
    %cst_87 = arith.constant dense<0.000000e+00> : vector<8x128xf32>
    %249 = tpu.matmul %247, %180, %cst_87 {dimension_numbers = #tpu.dot_dimension_numbers<[1], [0], [0], [1], [0, 0, 1, 1], [], []>} : vector<8x32xf32>, vector<32x128xf32>, vector<8x128xf32> -> vector<8x128xf32>
    %250 = vector.extract_strided_slice %187 {offsets = [24, 0], sizes = [8, 128], strides = [1, 1]} : vector<64x128xf32> to vector<8x128xf32>
    %251 = arith.addf %249, %250 : vector<8x128xf32>
    %252 = math.tanh %251 : vector<8x128xf32>
    %cst_88 = arith.constant 5.000000e-01 : f32
    %253 = vector.broadcast %cst_88 : f32 to vector<8x128xf32>
    %254 = arith.mulf %253, %252 : vector<8x128xf32>
    %cst_89 = arith.constant 5.000000e-01 : f32
    %255 = vector.broadcast %cst_89 : f32 to vector<8x128xf32>
    %256 = arith.addf %254, %255 : vector<8x128xf32>
    %257 = arith.select %5, %252, %256 : vector<8x128xi1>, vector<8x128xf32>
    %258 = vector.extract_strided_slice %257 {offsets = [0, 0], sizes = [8, 32], strides = [1, 1]} : vector<8x128xf32> to vector<8x32xf32>
    %259 = vector.extract_strided_slice %257 {offsets = [0, 32], sizes = [8, 32], strides = [1, 1]} : vector<8x128xf32> to vector<8x32xf32>
    %260 = vector.extract_strided_slice %257 {offsets = [0, 64], sizes = [8, 32], strides = [1, 1]} : vector<8x128xf32> to vector<8x32xf32>
    %261 = vector.extract_strided_slice %257 {offsets = [0, 96], sizes = [8, 32], strides = [1, 1]} : vector<8x128xf32> to vector<8x32xf32>
    %262 = arith.mulf %259, %245 : vector<8x32xf32>
    %263 = arith.mulf %258, %260 : vector<8x32xf32>
    %264 = arith.addf %262, %263 : vector<8x32xf32>
    %265 = math.tanh %264 : vector<8x32xf32>
    %266 = arith.mulf %261, %265 : vector<8x32xf32>
    %c24_90 = arith.constant 24 : index
    %c0_91 = arith.constant 0 : index
    %267 = vector.load %arg12[%c24_90, %c0_91] : memref<64x32xf32, #tpu.memory_space<vmem>>, vector<8x32xf32>
    tpu.vector_store %arg12[%c24_90, %c0_91], %266 {strides = array<i32>} : memref<64x32xf32, #tpu.memory_space<vmem>>, vector<8x32xf32>,
    %cst_92 = arith.constant dense<0.000000e+00> : vector<8x128xf32>
    %268 = tpu.matmul %266, %180, %cst_92 {dimension_numbers = #tpu.dot_dimension_numbers<[1], [0], [0], [1], [0, 0, 1, 1], [], []>} : vector<8x32xf32>, vector<32x128xf32>, vector<8x128xf32> -> vector<8x128xf32>
    %269 = vector.extract_strided_slice %187 {offsets = [32, 0], sizes = [8, 128], strides = [1, 1]} : vector<64x128xf32> to vector<8x128xf32>
    %270 = arith.addf %268, %269 : vector<8x128xf32>
    %271 = math.tanh %270 : vector<8x128xf32>
    %cst_93 = arith.constant 5.000000e-01 : f32
    %272 = vector.broadcast %cst_93 : f32 to vector<8x128xf32>
    %273 = arith.mulf %272, %271 : vector<8x128xf32>
    %cst_94 = arith.constant 5.000000e-01 : f32
    %274 = vector.broadcast %cst_94 : f32 to vector<8x128xf32>
    %275 = arith.addf %273, %274 : vector<8x128xf32>
    %276 = arith.select %5, %271, %275 : vector<8x128xi1>, vector<8x128xf32>
    %277 = vector.extract_strided_slice %276 {offsets = [0, 0], sizes = [8, 32], strides = [1, 1]} : vector<8x128xf32> to vector<8x32xf32>
    %278 = vector.extract_strided_slice %276 {offsets = [0, 32], sizes = [8, 32], strides = [1, 1]} : vector<8x128xf32> to vector<8x32xf32>
    %279 = vector.extract_strided_slice %276 {offsets = [0, 64], sizes = [8, 32], strides = [1, 1]} : vector<8x128xf32> to vector<8x32xf32>
    %280 = vector.extract_strided_slice %276 {offsets = [0, 96], sizes = [8, 32], strides = [1, 1]} : vector<8x128xf32> to vector<8x32xf32>
    %281 = arith.mulf %278, %264 : vector<8x32xf32>
    %282 = arith.mulf %277, %279 : vector<8x32xf32>
    %283 = arith.addf %281, %282 : vector<8x32xf32>
    %284 = math.tanh %283 : vector<8x32xf32>
    %285 = arith.mulf %280, %284 : vector<8x32xf32>
    %c32_95 = arith.constant 32 : index
    %c0_96 = arith.constant 0 : index
    %286 = vector.load %arg12[%c32_95, %c0_96] : memref<64x32xf32, #tpu.memory_space<vmem>>, vector<8x32xf32>
    tpu.vector_store %arg12[%c32_95, %c0_96], %285 {strides = array<i32>} : memref<64x32xf32, #tpu.memory_space<vmem>>, vector<8x32xf32>,
    %cst_97 = arith.constant dense<0.000000e+00> : vector<8x128xf32>
    %287 = tpu.matmul %285, %180, %cst_97 {dimension_numbers = #tpu.dot_dimension_numbers<[1], [0], [0], [1], [0, 0, 1, 1], [], []>} : vector<8x32xf32>, vector<32x128xf32>, vector<8x128xf32> -> vector<8x128xf32>
    %288 = vector.extract_strided_slice %187 {offsets = [40, 0], sizes = [8, 128], strides = [1, 1]} : vector<64x128xf32> to vector<8x128xf32>
    %289 = arith.addf %287, %288 : vector<8x128xf32>
    %290 = math.tanh %289 : vector<8x128xf32>
    %cst_98 = arith.constant 5.000000e-01 : f32
    %291 = vector.broadcast %cst_98 : f32 to vector<8x128xf32>
    %292 = arith.mulf %291, %290 : vector<8x128xf32>
    %cst_99 = arith.constant 5.000000e-01 : f32
    %293 = vector.broadcast %cst_99 : f32 to vector<8x128xf32>
    %294 = arith.addf %292, %293 : vector<8x128xf32>
    %295 = arith.select %5, %290, %294 : vector<8x128xi1>, vector<8x128xf32>
    %296 = vector.extract_strided_slice %295 {offsets = [0, 0], sizes = [8, 32], strides = [1, 1]} : vector<8x128xf32> to vector<8x32xf32>
    %297 = vector.extract_strided_slice %295 {offsets = [0, 32], sizes = [8, 32], strides = [1, 1]} : vector<8x128xf32> to vector<8x32xf32>
    %298 = vector.extract_strided_slice %295 {offsets = [0, 64], sizes = [8, 32], strides = [1, 1]} : vector<8x128xf32> to vector<8x32xf32>
    %299 = vector.extract_strided_slice %295 {offsets = [0, 96], sizes = [8, 32], strides = [1, 1]} : vector<8x128xf32> to vector<8x32xf32>
    %300 = arith.mulf %297, %283 : vector<8x32xf32>
    %301 = arith.mulf %296, %298 : vector<8x32xf32>
    %302 = arith.addf %300, %301 : vector<8x32xf32>
    %303 = math.tanh %302 : vector<8x32xf32>
    %304 = arith.mulf %299, %303 : vector<8x32xf32>
    %c40_100 = arith.constant 40 : index
    %c0_101 = arith.constant 0 : index
    %305 = vector.load %arg12[%c40_100, %c0_101] : memref<64x32xf32, #tpu.memory_space<vmem>>, vector<8x32xf32>
    tpu.vector_store %arg12[%c40_100, %c0_101], %304 {strides = array<i32>} : memref<64x32xf32, #tpu.memory_space<vmem>>, vector<8x32xf32>,
    %cst_102 = arith.constant dense<0.000000e+00> : vector<8x128xf32>
    %306 = tpu.matmul %304, %180, %cst_102 {dimension_numbers = #tpu.dot_dimension_numbers<[1], [0], [0], [1], [0, 0, 1, 1], [], []>} : vector<8x32xf32>, vector<32x128xf32>, vector<8x128xf32> -> vector<8x128xf32>
    %307 = vector.extract_strided_slice %187 {offsets = [48, 0], sizes = [8, 128], strides = [1, 1]} : vector<64x128xf32> to vector<8x128xf32>
    %308 = arith.addf %306, %307 : vector<8x128xf32>
    %309 = math.tanh %308 : vector<8x128xf32>
    %cst_103 = arith.constant 5.000000e-01 : f32
    %310 = vector.broadcast %cst_103 : f32 to vector<8x128xf32>
    %311 = arith.mulf %310, %309 : vector<8x128xf32>
    %cst_104 = arith.constant 5.000000e-01 : f32
    %312 = vector.broadcast %cst_104 : f32 to vector<8x128xf32>
    %313 = arith.addf %311, %312 : vector<8x128xf32>
    %314 = arith.select %5, %309, %313 : vector<8x128xi1>, vector<8x128xf32>
    %315 = vector.extract_strided_slice %314 {offsets = [0, 0], sizes = [8, 32], strides = [1, 1]} : vector<8x128xf32> to vector<8x32xf32>
    %316 = vector.extract_strided_slice %314 {offsets = [0, 32], sizes = [8, 32], strides = [1, 1]} : vector<8x128xf32> to vector<8x32xf32>
    %317 = vector.extract_strided_slice %314 {offsets = [0, 64], sizes = [8, 32], strides = [1, 1]} : vector<8x128xf32> to vector<8x32xf32>
    %318 = vector.extract_strided_slice %314 {offsets = [0, 96], sizes = [8, 32], strides = [1, 1]} : vector<8x128xf32> to vector<8x32xf32>
    %319 = arith.mulf %316, %302 : vector<8x32xf32>
    %320 = arith.mulf %315, %317 : vector<8x32xf32>
    %321 = arith.addf %319, %320 : vector<8x32xf32>
    %322 = math.tanh %321 : vector<8x32xf32>
    %323 = arith.mulf %318, %322 : vector<8x32xf32>
    %c48_105 = arith.constant 48 : index
    %c0_106 = arith.constant 0 : index
    %324 = vector.load %arg12[%c48_105, %c0_106] : memref<64x32xf32, #tpu.memory_space<vmem>>, vector<8x32xf32>
    tpu.vector_store %arg12[%c48_105, %c0_106], %323 {strides = array<i32>} : memref<64x32xf32, #tpu.memory_space<vmem>>, vector<8x32xf32>,
    %cst_107 = arith.constant dense<0.000000e+00> : vector<8x128xf32>
    %325 = tpu.matmul %323, %180, %cst_107 {dimension_numbers = #tpu.dot_dimension_numbers<[1], [0], [0], [1], [0, 0, 1, 1], [], []>} : vector<8x32xf32>, vector<32x128xf32>, vector<8x128xf32> -> vector<8x128xf32>
    %326 = vector.extract_strided_slice %187 {offsets = [56, 0], sizes = [8, 128], strides = [1, 1]} : vector<64x128xf32> to vector<8x128xf32>
    %327 = arith.addf %325, %326 : vector<8x128xf32>
    %328 = math.tanh %327 : vector<8x128xf32>
    %cst_108 = arith.constant 5.000000e-01 : f32
    %329 = vector.broadcast %cst_108 : f32 to vector<8x128xf32>
    %330 = arith.mulf %329, %328 : vector<8x128xf32>
    %cst_109 = arith.constant 5.000000e-01 : f32
    %331 = vector.broadcast %cst_109 : f32 to vector<8x128xf32>
    %332 = arith.addf %330, %331 : vector<8x128xf32>
    %333 = arith.select %5, %328, %332 : vector<8x128xi1>, vector<8x128xf32>
    %334 = vector.extract_strided_slice %333 {offsets = [0, 0], sizes = [8, 32], strides = [1, 1]} : vector<8x128xf32> to vector<8x32xf32>
    %335 = vector.extract_strided_slice %333 {offsets = [0, 32], sizes = [8, 32], strides = [1, 1]} : vector<8x128xf32> to vector<8x32xf32>
    %336 = vector.extract_strided_slice %333 {offsets = [0, 64], sizes = [8, 32], strides = [1, 1]} : vector<8x128xf32> to vector<8x32xf32>
    %337 = vector.extract_strided_slice %333 {offsets = [0, 96], sizes = [8, 32], strides = [1, 1]} : vector<8x128xf32> to vector<8x32xf32>
    %338 = arith.mulf %335, %321 : vector<8x32xf32>
    %339 = arith.mulf %334, %336 : vector<8x32xf32>
    %340 = arith.addf %338, %339 : vector<8x32xf32>
    %341 = math.tanh %340 : vector<8x32xf32>
    %342 = arith.mulf %337, %341 : vector<8x32xf32>
    %c56_110 = arith.constant 56 : index
    %c0_111 = arith.constant 0 : index
    %343 = vector.load %arg12[%c56_110, %c0_111] : memref<64x32xf32, #tpu.memory_space<vmem>>, vector<8x32xf32>
    tpu.vector_store %arg12[%c56_110, %c0_111], %342 {strides = array<i32>} : memref<64x32xf32, #tpu.memory_space<vmem>>, vector<8x32xf32>,
    %c1_112 = arith.constant 1 : index
    %c0_113 = arith.constant 0 : index
    %c0_114 = arith.constant 0 : index
    %344 = vector.load %arg10[%c1_112, %c0_113, %c0_114] : memref<2x8x32xf32, #tpu.memory_space<vmem>>, vector<1x8x32xf32>
    %345 = vector.shape_cast %344 : vector<1x8x32xf32> to vector<8x32xf32>
    %346 = vector.shape_cast %342 : vector<8x32xf32> to vector<1x8x32xf32>
    tpu.vector_store %arg10[%c1_112, %c0_113, %c0_114], %346 {strides = array<i32>} : memref<2x8x32xf32, #tpu.memory_space<vmem>>, vector<1x8x32xf32>,
    %c1_115 = arith.constant 1 : index
    %c0_116 = arith.constant 0 : index
    %c0_117 = arith.constant 0 : index
    %347 = vector.load %arg11[%c1_115, %c0_116, %c0_117] : memref<2x8x32xf32, #tpu.memory_space<vmem>>, vector<1x8x32xf32>
    %348 = vector.shape_cast %347 : vector<1x8x32xf32> to vector<8x32xf32>
    %349 = vector.shape_cast %340 : vector<8x32xf32> to vector<1x8x32xf32>
    tpu.vector_store %arg11[%c1_115, %c0_116, %c0_117], %349 {strides = array<i32>} : memref<2x8x32xf32, #tpu.memory_space<vmem>>, vector<1x8x32xf32>,
    %350 = tpu.iota {dimensions = array<i32: 0>} : vector<8x64xi32>
    %351 = tpu.iota {dimensions = array<i32: 1>} : vector<8x64xi32>
    %c8_i32 = arith.constant 8 : i32
    %352 = vector.broadcast %c8_i32 : i32 to vector<8x64xi32>
    %353 = arith.muli %350, %352 : vector<8x64xi32>
    %354 = arith.cmpi eq, %351, %353 : vector<8x64xi32>
    %355 = arith.extui %354 : vector<8x64xi1> to vector<8x64xi32>
    %356 = arith.sitofp %355 : vector<8x64xi32> to vector<8x64xf32>
    %c0_118 = arith.constant 0 : index
    %c0_119 = arith.constant 0 : index
    %357 = vector.load %arg12[%c0_118, %c0_119] : memref<64x32xf32, #tpu.memory_space<vmem>>, vector<64x32xf32>
    %cst_120 = arith.constant dense<0.000000e+00> : vector<8x32xf32>
    %358 = tpu.matmul %356, %357, %cst_120 {dimension_numbers = #tpu.dot_dimension_numbers<[1], [0], [0], [1], [0, 0, 1, 1], [], []>} : vector<8x64xf32>, vector<64x32xf32>, vector<8x32xf32> -> vector<8x32xf32>
    %c0_121 = arith.constant 0 : index
    %c0_122 = arith.constant 0 : index
    %359 = vector.load %arg7[%c0_121, %c0_122] : memref<32x4xf32, #tpu.memory_space<vmem>>, vector<32x4xf32>
    %cst_123 = arith.constant dense<0.000000e+00> : vector<8x4xf32>
    %360 = tpu.matmul %358, %359, %cst_123 {dimension_numbers = #tpu.dot_dimension_numbers<[1], [0], [0], [1], [0, 0, 1, 1], [], []>} : vector<8x32xf32>, vector<32x4xf32>, vector<8x4xf32> -> vector<8x4xf32>
    %c0_124 = arith.constant 0 : index
    %c0_125 = arith.constant 0 : index
    %361 = vector.load %arg8[%c0_124, %c0_125] : memref<1x4xf32, #tpu.memory_space<vmem>>, vector<1x4xf32>
    %362 = vector.broadcast %361 : vector<1x4xf32> to vector<8x4xf32>
    %363 = arith.addf %360, %362 : vector<8x4xf32>
    %364 = arith.negf %363 : vector<8x4xf32>
    %365 = math.exp %364 : vector<8x4xf32>
    %cst_126 = arith.constant 1.000000e+00 : f32
    %366 = vector.broadcast %cst_126 : f32 to vector<8x4xf32>
    %367 = arith.addf %366, %365 : vector<8x4xf32>
    %368 = arith.divf %366, %367 : vector<8x4xf32>
    %c0_127 = arith.constant 0 : index
    %c0_128 = arith.constant 0 : index
    %369 = vector.load %arg9[%c0_127, %c0_128] : memref<8x4xf32, #tpu.memory_space<vmem>>, vector<8x4xf32>
    tpu.vector_store %arg9[%c0_127, %c0_128], %368 {strides = array<i32>} : memref<8x4xf32, #tpu.memory_space<vmem>>, vector<8x4xf32>,
    return
  }
  func.func @transform_0(%arg0: i32) -> (i32, i32) {
    %c0_i32 = arith.constant 0 : i32
    %c0_i32_0 = arith.constant 0 : i32
    %c0_i32_1 = arith.constant 0 : i32
    return %c0_i32, %c0_i32_0 : i32, i32
  }
  func.func @transform_1(%arg0: i32) -> (i32, i32, i32) {
    %c0_i32 = arith.constant 0 : i32
    %c0_i32_0 = arith.constant 0 : i32
    %c0_i32_1 = arith.constant 0 : i32
    %c0_i32_2 = arith.constant 0 : i32
    return %c0_i32, %c0_i32_0, %c0_i32_1 : i32, i32, i32
  }
  func.func @transform_2(%arg0: i32) -> (i32, i32, i32) {
    %c0_i32 = arith.constant 0 : i32
    %c0_i32_0 = arith.constant 0 : i32
    %c0_i32_1 = arith.constant 0 : i32
    %c0_i32_2 = arith.constant 0 : i32
    return %c0_i32, %c0_i32_0, %c0_i32_1 : i32, i32, i32
  }
  func.func @transform_3(%arg0: i32) -> (i32, i32, i32) {
    %c0_i32 = arith.constant 0 : i32
    %c0_i32_0 = arith.constant 0 : i32
    %c0_i32_1 = arith.constant 0 : i32
    %c0_i32_2 = arith.constant 0 : i32
    return %c0_i32, %c0_i32_0, %c0_i32_1 : i32, i32, i32
  }
  func.func @transform_4(%arg0: i32) -> (i32, i32, i32) {
    %c0_i32 = arith.constant 0 : i32
    %c0_i32_0 = arith.constant 0 : i32
    %c0_i32_1 = arith.constant 0 : i32
    %c0_i32_2 = arith.constant 0 : i32
    return %c0_i32, %c0_i32_0, %c0_i32_1 : i32, i32, i32
  }
  func.func @transform_5(%arg0: i32) -> (i32, i32, i32) {
    %c0_i32 = arith.constant 0 : i32
    %c0_i32_0 = arith.constant 0 : i32
    %c0_i32_1 = arith.constant 0 : i32
    %c0_i32_2 = arith.constant 0 : i32
    return %c0_i32, %c0_i32_0, %c0_i32_1 : i32, i32, i32
  }
  func.func @transform_6(%arg0: i32) -> (i32, i32) {
    %c0_i32 = arith.constant 0 : i32
    %c0_i32_0 = arith.constant 0 : i32
    %c0_i32_1 = arith.constant 0 : i32
    return %c0_i32, %c0_i32_0 : i32, i32
  }
  func.func @transform_7(%arg0: i32) -> (i32, i32) {
    %c0_i32 = arith.constant 0 : i32
    %c0_i32_0 = arith.constant 0 : i32
    %c0_i32_1 = arith.constant 0 : i32
    return %c0_i32, %c0_i32_0 : i32, i32
  }
  func.func @transform_8(%arg0: i32) -> (i32, i32) {
    %c0_i32 = arith.constant 0 : i32
    %c0_i32_0 = arith.constant 0 : i32
    %c0_i32_1 = arith.constant 0 : i32
    return %c0_i32, %c0_i32_0 : i32, i32
  }
  func.func @transform_9(%arg0: i32) -> (i32, i32, i32) {
    %c0_i32 = arith.constant 0 : i32
    %c0_i32_0 = arith.constant 0 : i32
    %c0_i32_1 = arith.constant 0 : i32
    %c0_i32_2 = arith.constant 0 : i32
    return %c0_i32, %c0_i32_0, %c0_i32_1 : i32, i32, i32
  }
  func.func @transform_10(%arg0: i32) -> (i32, i32, i32) {
    %c0_i32 = arith.constant 0 : i32
    %c0_i32_0 = arith.constant 0 : i32
    %c0_i32_1 = arith.constant 0 : i32
    %c0_i32_2 = arith.constant 0 : i32
    return %c0_i32, %c0_i32_0, %c0_i32_1 : i32, i32, i32
  }
}

</mosaic_0001>

<bundles_post_ra>
// kernel: tpu_custom_call.1
= control target key start
LH: loop header
LB: loop body
LE: loop exit
PB: predicated region body
PF: predicated region fallthrough
CT: control target
= control target key end

     0   :  { %16 = vsyncpa [#allocation4], 0  ;;  %s3291_s0 = inlined_call_operand.vmem [shape: f32[64,16], index: 0, kind: input, shape index: {}]   ;;  %s3292_s1 = inlined_call_operand.vmem [shape: f32[2,32,128], index: 1, kind: input, shape index: {}]   ;;  %s3293_s2 = inlined_call_operand.hbm [shape: f32[2,32,128], index: 2, kind: input, shape index: {}]   ;;  %s3294_s3 = inlined_call_operand.vmem [shape: f32[2,1,128], index: 3, kind: input, shape index: {}]   ;;  %s3295_s4 = inlined_call_operand.vmem [shape: f32[2,8,32], index: 4, kind: input, shape index: {}]   ;;  %s3296_s5 = inlined_call_operand.vmem [shape: f32[2,8,32], index: 5, kind: input, shape index: {}]   ;;  %s3297_s6 = inlined_call_operand.vmem [shape: f32[32,4], index: 6, kind: input, shape index: {}]   ;;  %s3298_s7 = inlined_call_operand.vmem [shape: f32[1,4], index: 7, kind: input, shape index: {}]   ;;  %s3299_s8 = inlined_call_operand.vmem [shape: f32[8,4], index: 8, kind: output, shape index: {0}]   ;;  %s3300_s9 = inlined_call_operand.hbm [shape: f32[2,8,32], index: 9, kind: output, shape index: {1}]   ;;  %s3301_s10 = inlined_call_operand.hbm [shape: f32[2,8,32], index: 10, kind: output, shape index: {2}]  }
   0x1   :  { %17 = vsyncpa [#allocation5], 0 }
   0x2   :  { %18 = vsyncpa [#allocation8], 0  ;;  %s2723_s13 = smov [#allocation3]  }
   0x3   :  { %s28_s14 = sshll.u32 %s2723_s13, 4  ;;  %s29_s14 = int_to_ptr.vmem [resolvable:$true] %s28_s14 }
   0x4   :  { %s2665_s15 = scalar_lea.vmem %s29_s14, 1024  ;;  %p2670_p1 = scmp.lt.s32.totalorder %s29_s14, %s29_s14 }
   0x5   :  { %p2666_p0 = scmp.ne.s32.totalorder %s29_s14, %s2665_s15  ;;  %p2671_p2 = scmp.lt.s32.totalorder %s2665_s15, %s2665_s15 }
   0x7   :  { %p2672_p3 = por %p2671_p2, %p2670_p1 }
   0x9   :  { %p2673_p4 = pnand %p2672_p3, %p2666_p0 }
   0xb   :  { %2676 = shalt.err (!%p2673_p4)
}
   0xc   :  { %s2724_s16 = smov 128   ;;  %s2725_s17 = smov 8  }
   0xd   :  { %34 = dma.hbm_to_vmem [thread:$0]  %s3293_s2, 1024, %s29_s14, [#allocation4], %s2724_s16, %s2724_s16, %s2725_s17  }
   0xe   :  { %2717 = dma.done.wait [#allocation4], 1024  }
   0xf   :  { %2718 = vsyncadd [#allocation4], 4294966272  ;;  %v2726_v0 = vmov 0.0   ;;  %vm2727_vm0 = vmmov 0   ;;  %v66_v1 = vld [vmem:[%s3292_s1 + $0x8] sm:$0xff]  ;;  %v2800_v2 = vld [vmem:[#allocation3 + $0x18] sm:$0xff]  ;;  %v48_v17 = vlaneseq }
  0x10   :  { %2353 = vmatprep.subr.mxu1 %v2726_v0  ;;  %2361 = vmatprep.mubr.msk.f32.mxu1 %vm2727_vm0, %v2726_v0  ;;  %v65_v3 = vld [vmem:[%s3292_s1] sm:$0xff]  ;;  %v2806_v4 = vld [vmem:[#allocation3 + $0x10] sm:$0xff]  ;;  %vm74_vm1 = vcmask 130048   ;;  %v54_v6 = vld [vmem:[%s3291_s0 + $0x8] sm:$0xff]  ;;  %vm206_vm2 = vcmask 261120   ;;  %s2728_s11 = smov 64  }
  0x11   :  { %2337 = vmatprep.subr.mxu0 %v66_v1  ;;  %2354 = vmatpush3.msra.mxu1 %v2800_v2  ;;  %v53_v5 = vld [vmem:[%s3291_s0] sm:$0xff]  ;;  %v2816_v7 = vld [vmem:[#allocation3 + $0x8] sm:$0xff]  ;;  %v2857_v18 = vand.u32 127, %v48_v17  ;;  %s2729_s14 = smov 32   ;;  %v55_v48 = vld [vmem:[%s3291_s0 + $0x10] sm:$0xff]  ;;  %vm1972_vm7 = vcmask 523264  }
  0x12   :  { %2338 = vmatpush3.msra.mxu0 %v66_v1  ;;  %2355 = vmatprep.subr.mxu1 %v2726_v0  ;;  %v2821_v8 = vld [vmem:[#allocation3] sm:$0xff]  ;;  %v56_v49 = vld [vmem:[%s3291_s0 + $0x18] sm:$0xff]  ;;  %v58_v51 = vld [vmem:[%s3291_s0 + $0x28] sm:$0xff]  ;;  %s2731_s27 = smov [#allocation6]   ;;  %s2732_s28 = smov [#allocation7]  }
  0x13   :  { %2339 = vmatprep.subr.mxu0 %v65_v3  ;;  %2356 = vmatpush3.msra.mxu1 %v2806_v4  ;;  %v204_v9 = vld [vmem:[%s3295_s4] sm:$0xff]  ;;  %vm50_vm3 = vcmp.ge.s32.totalorder %v2857_v18, 64  ;;  %vm51_vm4 = vcmp.lt.s32.totalorder %v2857_v18, 96  ;;  %v59_v52 = vld [vmem:[%s3291_s0 + $0x30] sm:$0xff]  ;;  %v60_v53 = vld [vmem:[%s3291_s0 + $0x38] sm:$0xff]  ;;  %s2157_s29 = sshll.u32 %s2732_s28, 4  ;;  %s2158_s29 = int_to_ptr.vmem [resolvable:$true] %s2157_s29 }
  0x14   :  { %2340 = vmatpush3.msra.mxu0 %v65_v3  ;;  %2341 = vmatprep.mubr.msk.f32.mxu0 %vm74_vm1, %v53_v5  ;;  %v2853_v11 = vld [vmem:[%s3294_s3] ss:$0 sm:$0xff]  ;;  %vm2861_vm5 = vmand %vm50_vm3, %vm51_vm4 }
  0x15   :  { %2357 = vmatprep.subr.mxu1 %v2726_v0  ;;  %2342 = vmatmul.mubr.msk.f32.vlgmr.msra.gmra.mxu0 %vm74_vm1, %v54_v6  ;;  %v205_v24 = vld [vmem:[%s3296_s5] sm:$0xff] }
  0x16   :  { %2358 = vmatpush3.msra.mxu1 %v2816_v7  ;;  %2375 = vmatprep.subr.mxu0 %v2726_v0  ;;  %v57_v50 = vld [vmem:[%s3291_s0 + $0x20] sm:$0xff]  ;;  %s2145_s0 = sshll.u32 %s2731_s27, 4  ;;  %s2146_s0 = int_to_ptr.vmem [resolvable:$true] %s2145_s0 }
  0x17   :  { %2359 = vmatprep.subr.mxu1 %v2726_v0  ;;  %2376 = vmatpush3.msra.mxu0 %v2800_v2  ;;  %s2677_s30 = scalar_lea.vmem %s2146_s0, 256  ;;  %p2682_p6 = scmp.lt.s32.totalorder %s2146_s0, %s2146_s0 }
  0x18   :  { %2360 = vmatpush3.msra.mxu1 %v2821_v8  ;;  %2377 = vmatprep.subr.mxu0 %v2726_v0  ;;  %p2678_p5 = scmp.ne.s32.totalorder %s2146_s0, %s2677_s30  ;;  %p2683_p7 = scmp.lt.s32.totalorder %s2677_s30, %s2677_s30 }
  0x19   :  { %2362 = vmatmul.mubr.msk.f32.vlgmr.msra.gmra.mxu1 %vm206_vm2, %v204_v9  ;;  %2364 = vmatprep.subr.mxu1 %v2726_v0 }
  0x1a   :  { %2365 = vmatpush3.msra.mxu1 %v2800_v2  ;;  %2372 = vmatprep.mubr.msk.f32.mxu1 %vm2727_vm0, %v2726_v0  ;;  %p2684_p8 = por %p2683_p7, %p2682_p6 }
  0x1b   :  { %2366 = vmatprep.subr.mxu1 %v2726_v0  ;;  %2378 = vmatpush3.msra.mxu0 %v2806_v4 }
  0x1c   :  { %2367 = vmatpush3.msra.mxu1 %v2806_v4  ;;  %2379 = vmatprep.subr.mxu0 %v2726_v0  ;;  %p2685_p9 = pnand %p2684_p8, %p2678_p5 }
  0x1d   :  { %2368 = vmatprep.subr.mxu1 %v2726_v0  ;;  %2380 = vmatpush3.msra.mxu0 %v2816_v7 }
  0x1e   :  { %2369 = vmatpush3.msra.mxu1 %v2816_v7  ;;  %2381 = vmatprep.subr.mxu0 %v2726_v0 }
  0x1f   :  { %2370 = vmatprep.subr.mxu1 %v2726_v0  ;;  %2382 = vmatpush3.msra.mxu0 %v2821_v8 }
  0x20   :  { %2371 = vmatpush3.msra.mxu1 %v2821_v8  ;;  %2397 = vmatprep.subr.mxu0 %v2726_v0 }
  0x21   :  { %2386 = vmatprep.subr.mxu1 %v2726_v0  ;;  %2344 = vmatprep.mubr.msk.f32.mxu0 %vm74_vm1, %v55_v48 }
  0x22   :  { %2345 = vmatmul.mubr.msk.f32.gmra.mxu0 %vm74_vm1, %v56_v49 }
  0x23   :  { %2347 = vmatprep.mubr.msk.f32.mxu0 %vm74_vm1, %v57_v50 }
  0x26   :  { %2348 = vmatmul.mubr.msk.f32.gmra.mxu0 %vm74_vm1, %v58_v51 }
  0x27   :  { %2350 = vmatprep.mubr.msk.f32.mxu0 %vm74_vm1, %v59_v52 }
  0x2a   :  { %2351 = vmatmul.mubr.msk.f32.gmra.mxu0 %vm74_vm1, %v60_v53 }
  0x2b   :  { %2383 = vmatprep.mubr.msk.f32.mxu0 %vm2727_vm0, %v2726_v0 }
  0xd5   :  { %v2343_v10 = vpop.f32.mrf.mxu0 }
  0xd6   :  { %v171_v35 = vadd.f32 %v2343_v10, %v2853_v11 }
  0xd7   :  { %v165_v12 = vpop.f32.mrf.mxu0 }
  0xd8   :  { %v166_v13 = vadd.f32 %v2853_v11, %v165_v12 }
  0xd9   :  { %v276_v14 = vpop.f32.mrf.mxu1 }
  0xda   :  { %v277_v15 = vadd.f32 %v276_v14, %v166_v13 }
  0xdb   :  { %v2363_v16 = vpop.f32.mrf.mxu1 }
  0xdc   :  { %2589 = vtanh.f32 %v277_v15 }
  0xe2   :  { %v2346_v58 = vpop.f32.mrf.mxu0 }
  0xe4   :  { %v175_v59 = vpop.f32.mrf.mxu0 }
  0xe5   :  { %v176_v1 = vadd.f32 %v2853_v11, %v175_v59 }
  0xe6   :  { %v2932_v60 = vpop.f32.mrf.mxu0 }
  0xe8   :  { %v2934_v61 = vpop.f32.mrf.mxu0 }
  0xe9   :  { %v2590_v19 = vpop.eup %2589 }
  0xea   :  { %v281_v20 = vmul.f32 0.5, %v2590_v19  ;;  %v2936_v62 = vpop.f32.mrf.mxu0 }
  0xec   :  { %v282_v22 = vadd.f32 0.5, %v281_v20  ;;  %v2938_v63 = vpop.f32.mrf.mxu0 }
  0xee   :  { %v283_v23 = vsel %vm2861_vm5, %v2590_v19, %v282_v22 }
  0xef   :  { %290 = vrot.lane.b32.xlu0 %v283_v23, %s2728_s11 }
  0xf3   :  { %285 = vrot.lane.b32.xlu0 %v205_v24, %s2729_s14 }
 0x161   :  { %v291_v25 = vpop.permute.xlu0 %290 }
 0x162   :  { %v293_v26 = vmul.f32 %v291_v25, %v283_v23 }
 0x164   :  { %295 = vrot.lane.b32.xlu1 %v293_v26, %s2729_s14  ;;  %v181_v26 = vadd.f32 %v2346_v58, %v2853_v11 }
 0x165   :  { %v286_v27 = vpop.permute.xlu0 %285 }
 0x166   :  { %v288_v28 = vmul.f32 %v286_v27, %v283_v23 }
 0x1d6   :  { %v296_v29 = vpop.permute.xlu1 %295 }
 0x1d7   :  { %v298_v30 = vadd.f32 %v296_v29, %v288_v28 }
 0x1d9   :  { %2591 = vtanh.f32 %v298_v30 }
 0x1e6   :  { %v2592_v31 = vpop.eup %2591 }
 0x1e7   :  { %301 = vrot.lane.b32.xlu1 %v2592_v31, %s2728_s11 }
 0x259   :  { %v302_v32 = vpop.permute.xlu1 %301 }
 0x25a   :  { %v304_v33 = vmul.f32 %v302_v32, %v283_v23 }
 0x25c   :  { %306 = vrot.lane.b32.xlu0 %v304_v33, %s2729_s14 }
 0x2ce   :  { %v307_v34 = vpop.permute.xlu0 %306 }
 0x2cf   :  { %309 = vst.msk [vmem:[#allocation2] sm:$0xff] %vm206_vm2, %v307_v34  ;;  %2373 = vmatmul.mubr.msk.f32.vlgmr.msra.gmra.mxu1 %vm206_vm2, %v307_v34 }
 0x2d0   :  { %2387 = vmatpush3.msra.mxu1 %v2800_v2  ;;  %2394 = vmatprep.mubr.msk.f32.mxu1 %vm2727_vm0, %v2726_v0 }
 0x2d1   :  { %2388 = vmatprep.subr.mxu1 %v2726_v0 }
 0x2d2   :  { %2389 = vmatpush3.msra.mxu1 %v2806_v4 }
 0x2d3   :  { %2390 = vmatprep.subr.mxu1 %v2726_v0 }
 0x2d4   :  { %2391 = vmatpush3.msra.mxu1 %v2816_v7 }
 0x2d5   :  { %2392 = vmatprep.subr.mxu1 %v2726_v0 }
 0x2d6   :  { %2393 = vmatpush3.msra.mxu1 %v2821_v8 }
 0x2d7   :  { %2408 = vmatprep.subr.mxu1 %v2726_v0 }
 0x38f   :  { %v378_v36 = vpop.f32.mrf.mxu1 }
 0x390   :  { %v379_v37 = vadd.f32 %v378_v36, %v171_v35 }
 0x391   :  { %v2374_v38 = vpop.f32.mrf.mxu1 }
 0x392   :  { %2593 = vtanh.f32 %v379_v37 }
 0x39f   :  { %v2594_v39 = vpop.eup %2593 }
 0x3a0   :  { %v383_v40 = vmul.f32 0.5, %v2594_v39 }
 0x3a2   :  { %v384_v41 = vadd.f32 0.5, %v383_v40 }
 0x3a4   :  { %v385_v42 = vsel %vm2861_vm5, %v2594_v39, %v384_v41 }
 0x3a5   :  { %388 = vrot.lane.b32.xlu1 %v385_v42, %s2728_s11  ;;  %v386_v45 = vmul.f32 %v385_v42, %v298_v30 }
 0x417   :  { %v389_v43 = vpop.permute.xlu1 %388 }
 0x418   :  { %v391_v44 = vmul.f32 %v389_v43, %v385_v42  ;;  %v186_v43 = vadd.f32 %v2853_v11, %v2934_v61 }
 0x41a   :  { %393 = vrot.lane.b32.xlu0 %v391_v44, %s2729_s14 }
 0x48c   :  { %v394_v46 = vpop.permute.xlu0 %393 }
 0x48d   :  { %v396_v47 = vadd.f32 %v394_v46, %v386_v45 }
 0x48f   :  { %2595 = vtanh.f32 %v396_v47 }
 0x49c   :  { %v2596_v54 = vpop.eup %2595 }
 0x49d   :  { %399 = vrot.lane.b32.xlu1 %v2596_v54, %s2728_s11 }
 0x50f   :  { %v400_v55 = vpop.permute.xlu1 %399 }
 0x510   :  { %v402_v56 = vmul.f32 %v400_v55, %v385_v42 }
 0x512   :  { %404 = vrot.lane.b32.xlu0 %v402_v56, %s2729_s14 }
 0x584   :  { %v405_v57 = vpop.permute.xlu0 %404 }
 0x585   :  { %407 = vst.msk [vmem:[#allocation2 + $0x8] sm:$0xff] %vm206_vm2, %v405_v57  ;;  %2384 = vmatmul.mubr.msk.f32.vlgmr.msra.gmra.mxu0 %vm206_vm2, %v405_v57 }
 0x586   :  { %2398 = vmatpush3.msra.mxu0 %v2800_v2  ;;  %2405 = vmatprep.mubr.msk.f32.mxu0 %vm2727_vm0, %v2726_v0 }
 0x587   :  { %2399 = vmatprep.subr.mxu0 %v2726_v0 }
 0x588   :  { %2400 = vmatpush3.msra.mxu0 %v2806_v4 }
 0x589   :  { %2401 = vmatprep.subr.mxu0 %v2726_v0 }
 0x58a   :  { %2402 = vmatpush3.msra.mxu0 %v2816_v7 }
 0x58b   :  { %2403 = vmatprep.subr.mxu0 %v2726_v0 }
 0x58c   :  { %2404 = vmatpush3.msra.mxu0 %v2821_v8 }
 0x58d   :  { %2419 = vmatprep.subr.mxu0 %v2726_v0 }
 0x645   :  { %v476_v3 = vpop.f32.mrf.mxu0 }
 0x646   :  { %v477_v5 = vadd.f32 %v476_v3, %v176_v1 }
 0x647   :  { %v2385_v6 = vpop.f32.mrf.mxu0 }
 0x648   :  { %2597 = vtanh.f32 %v477_v5 }
 0x655   :  { %v2598_v9 = vpop.eup %2597 }
 0x656   :  { %v481_v10 = vmul.f32 0.5, %v2598_v9 }
 0x658   :  { %v482_v12 = vadd.f32 0.5, %v481_v10 }
 0x65a   :  { %v483_v13 = vsel %vm2861_vm5, %v2598_v9, %v482_v12 }
 0x65b   :  { %486 = vrot.lane.b32.xlu1 %v483_v13, %s2728_s11  ;;  %v484_v16 = vmul.f32 %v483_v13, %v396_v47 }
 0x6cd   :  { %v487_v14 = vpop.permute.xlu1 %486 }
 0x6ce   :  { %v489_v15 = vmul.f32 %v487_v14, %v483_v13 }
 0x6d0   :  { %491 = vrot.lane.b32.xlu0 %v489_v15, %s2729_s14 }
 0x742   :  { %v492_v19 = vpop.permute.xlu0 %491 }
 0x743   :  { %v494_v20 = vadd.f32 %v492_v19, %v484_v16 }
 0x745   :  { %2599 = vtanh.f32 %v494_v20 }
 0x752   :  { %v2600_v22 = vpop.eup %2599 }
 0x753   :  { %497 = vrot.lane.b32.xlu1 %v2600_v22, %s2728_s11  ;;  %v1002_v22 = vld [vmem:[#allocation2] sm:$0xff] }
 0x7c5   :  { %v498_v23 = vpop.permute.xlu1 %497 }
 0x7c6   :  { %v500_v24 = vmul.f32 %v498_v23, %v483_v13  ;;  %v2193_v23 = vld [vmem:[%s3292_s1 + $0x28] sm:$0xff] }
 0x7c8   :  { %502 = vrot.lane.b32.xlu0 %v500_v24, %s2729_s14  ;;  %v2192_v24 = vld [vmem:[%s3292_s1 + $0x20] sm:$0xff] }
 0x83a   :  { %v503_v25 = vpop.permute.xlu0 %502 }
 0x83b   :  { %505 = vst.msk [vmem:[#allocation2 + $0x10] sm:$0xff] %vm206_vm2, %v503_v25  ;;  %2395 = vmatmul.mubr.msk.f32.vlgmr.msra.gmra.mxu1 %vm206_vm2, %v503_v25  ;;  %v1003_v25 = vld [vmem:[#allocation2 + $0x8] sm:$0xff] }
 0x83c   :  { %2409 = vmatpush3.msra.mxu1 %v2800_v2  ;;  %2416 = vmatprep.mubr.msk.f32.mxu1 %vm2727_vm0, %v2726_v0 }
 0x83d   :  { %2410 = vmatprep.subr.mxu1 %v2726_v0 }
 0x83e   :  { %2411 = vmatpush3.msra.mxu1 %v2806_v4 }
 0x83f   :  { %2412 = vmatprep.subr.mxu1 %v2726_v0 }
 0x840   :  { %2413 = vmatpush3.msra.mxu1 %v2816_v7 }
 0x841   :  { %2414 = vmatprep.subr.mxu1 %v2726_v0 }
 0x842   :  { %2415 = vmatpush3.msra.mxu1 %v2821_v8 }
 0x843   :  { %2430 = vmatprep.subr.mxu1 %v2726_v0 }
 0x8fb   :  { %v574_v27 = vpop.f32.mrf.mxu1 }
 0x8fc   :  { %v575_v28 = vadd.f32 %v574_v27, %v181_v26  ;;  %v1004_v26 = vld [vmem:[#allocation2 + $0x10] sm:$0xff] }
 0x8fd   :  { %v2396_v29 = vpop.f32.mrf.mxu1 }
 0x8fe   :  { %2601 = vtanh.f32 %v575_v28 }
 0x90b   :  { %v2602_v30 = vpop.eup %2601 }
 0x90c   :  { %v579_v31 = vmul.f32 0.5, %v2602_v30 }
 0x90e   :  { %v580_v32 = vadd.f32 0.5, %v579_v31 }
 0x910   :  { %v581_v33 = vsel %vm2861_vm5, %v2602_v30, %v580_v32  ;;  %v196_v30 = vadd.f32 %v2853_v11, %v2938_v63 }
 0x911   :  { %584 = vrot.lane.b32.xlu1 %v581_v33, %s2728_s11  ;;  %v582_v36 = vmul.f32 %v581_v33, %v494_v20  ;;  %v2194_v20 = vld [vmem:[%s3292_s1 + $0x30] sm:$0xff] }
 0x983   :  { %v585_v34 = vpop.permute.xlu1 %584 }
 0x984   :  { %v587_v35 = vmul.f32 %v585_v34, %v581_v33 }
 0x986   :  { %589 = vrot.lane.b32.xlu0 %v587_v35, %s2729_s14 }
 0x9f8   :  { %v590_v37 = vpop.permute.xlu0 %589 }
 0x9f9   :  { %v592_v38 = vadd.f32 %v590_v37, %v582_v36 }
 0x9fb   :  { %2603 = vtanh.f32 %v592_v38 }
 0xa08   :  { %v2604_v39 = vpop.eup %2603 }
 0xa09   :  { %595 = vrot.lane.b32.xlu1 %v2604_v39, %s2728_s11 }
 0xa7b   :  { %v596_v40 = vpop.permute.xlu1 %595 }
 0xa7c   :  { %v598_v41 = vmul.f32 %v596_v40, %v581_v33 }
 0xa7e   :  { %600 = vrot.lane.b32.xlu0 %v598_v41, %s2729_s14 }
 0xaf0   :  { %v601_v42 = vpop.permute.xlu0 %600 }
 0xaf1   :  { %603 = vst.msk [vmem:[#allocation2 + $0x18] sm:$0xff] %vm206_vm2, %v601_v42  ;;  %2406 = vmatmul.mubr.msk.f32.vlgmr.msra.gmra.mxu0 %vm206_vm2, %v601_v42 }
 0xaf2   :  { %2420 = vmatpush3.msra.mxu0 %v2800_v2  ;;  %2427 = vmatprep.mubr.msk.f32.mxu0 %vm2727_vm0, %v2726_v0 }
 0xaf3   :  { %2421 = vmatprep.subr.mxu0 %v2726_v0 }
 0xaf4   :  { %2422 = vmatpush3.msra.mxu0 %v2806_v4 }
 0xaf5   :  { %2423 = vmatprep.subr.mxu0 %v2726_v0 }
 0xaf6   :  { %2424 = vmatpush3.msra.mxu0 %v2816_v7 }
 0xaf7   :  { %2425 = vmatprep.subr.mxu0 %v2726_v0 }
 0xaf8   :  { %2426 = vmatpush3.msra.mxu0 %v2821_v8  ;;  %v1005_v27 = vld [vmem:[#allocation2 + $0x18] sm:$0xff] }
 0xbb1   :  { %v672_v44 = vpop.f32.mrf.mxu0 }
 0xbb2   :  { %v673_v45 = vadd.f32 %v672_v44, %v186_v43  ;;  %v3036_v43 = vld [vmem:[#allocation3 + $0x38] sm:$0xff]  ;;  %v3039_v44 = vld [vmem:[#allocation3 + $0x30] sm:$0xff] }
 0xbb3   :  { %v2407_v46 = vpop.f32.mrf.mxu0 }
 0xbb4   :  { %2605 = vtanh.f32 %v673_v45  ;;  %v3043_v45 = vld [vmem:[#allocation3 + $0x28] sm:$0xff]  ;;  %v3047_v46 = vld [vmem:[#allocation3 + $0x20] sm:$0xff] }
 0xbc1   :  { %v2606_v47 = vpop.eup %2605 }
 0xbc2   :  { %v677_v48 = vmul.f32 0.5, %v2606_v47 }
 0xbc4   :  { %v678_v49 = vadd.f32 0.5, %v677_v48 }
 0xbc6   :  { %v679_v50 = vsel %vm2861_vm5, %v2606_v47, %v678_v49  ;;  %v2207_v49 = vld [vmem:[%s3296_s5 + $0x8] sm:$0xff] }
 0xbc7   :  { %682 = vrot.lane.b32.xlu1 %v679_v50, %s2728_s11  ;;  %v680_v53 = vmul.f32 %v679_v50, %v592_v38 }
 0xc39   :  { %v683_v51 = vpop.permute.xlu1 %682 }
 0xc3a   :  { %v685_v52 = vmul.f32 %v683_v51, %v679_v50  ;;  %v2206_v51 = vld [vmem:[%s3295_s4 + $0x8] sm:$0xff] }
 0xc3c   :  { %687 = vrot.lane.b32.xlu0 %v685_v52, %s2729_s14 }
 0xcae   :  { %v688_v54 = vpop.permute.xlu0 %687 }
 0xcaf   :  { %v690_v55 = vadd.f32 %v688_v54, %v680_v53  ;;  %v201_v53 = vadd.f32 %v2936_v62, %v2853_v11 }
 0xcb1   :  { %2607 = vtanh.f32 %v690_v55 }
 0xcbe   :  { %v2608_v56 = vpop.eup %2607 }
 0xcbf   :  { %693 = vrot.lane.b32.xlu1 %v2608_v56, %s2728_s11 }
 0xd31   :  { %v694_v57 = vpop.permute.xlu1 %693 }
 0xd32   :  { %v696_v58 = vmul.f32 %v694_v57, %v679_v50 }
 0xd34   :  { %698 = vrot.lane.b32.xlu0 %v696_v58, %s2729_s14 }
 0xda6   :  { %v699_v59 = vpop.permute.xlu0 %698 }
 0xda7   :  { %701 = vst.msk [vmem:[#allocation2 + $0x20] sm:$0xff] %vm206_vm2, %v699_v59  ;;  %2417 = vmatmul.mubr.msk.f32.vlgmr.msra.gmra.mxu1 %vm206_vm2, %v699_v59  ;;  %v3089_v59 = vld [vmem:[%s3294_s3 + $0x1] ss:$0 sm:$0xff]  ;;  %s2730_s3 = smov 96  }
 0xda8   :  { %2431 = vmatpush3.msra.mxu1 %v2800_v2  ;;  %2438 = vmatprep.mubr.msk.f32.mxu1 %vm2727_vm0, %v2726_v0  ;;  %v191_v2 = vadd.f32 %v2932_v60, %v2853_v11  ;;  %v2195_v60 = vld [vmem:[%s3292_s1 + $0x38] sm:$0xff] }
 0xda9   :  { %2432 = vmatprep.subr.mxu1 %v2726_v0  ;;  %2441 = vmatprep.subr.mxu0 %v2195_v60 }
 0xdaa   :  { %2433 = vmatpush3.msra.mxu1 %v2806_v4 }
 0xdab   :  { %2434 = vmatprep.subr.mxu1 %v2726_v0 }
 0xdac   :  { %2435 = vmatpush3.msra.mxu1 %v2816_v7 }
 0xdad   :  { %2436 = vmatprep.subr.mxu1 %v2726_v0 }
 0xdae   :  { %2437 = vmatpush3.msra.mxu1 %v2821_v8  ;;  %v1006_v28 = vld [vmem:[#allocation2 + $0x20] sm:$0xff] }
 0xdaf   :  { %2461 = vmatprep.subr.mxu1 %v2726_v0 }
 0xe67   :  { %v770_v61 = vpop.f32.mrf.mxu1 }
 0xe68   :  { %v771_v1 = vadd.f32 %v770_v61, %v191_v2 }
 0xe69   :  { %v2418_v3 = vpop.f32.mrf.mxu1 }
 0xe6a   :  { %2609 = vtanh.f32 %v771_v1 }
 0xe77   :  { %v2610_v5 = vpop.eup %2609 }
 0xe78   :  { %v775_v6 = vmul.f32 0.5, %v2610_v5 }
 0xe7a   :  { %v776_v4 = vadd.f32 0.5, %v775_v6 }
 0xe7c   :  { %v777_v9 = vsel %vm2861_vm5, %v2610_v5, %v776_v4 }
 0xe7d   :  { %780 = vrot.lane.b32.xlu1 %v777_v9, %s2728_s11  ;;  %v778_v8 = vmul.f32 %v777_v9, %v690_v55 }
 0xeef   :  { %v781_v7 = vpop.permute.xlu1 %780 }
 0xef0   :  { %v783_v10 = vmul.f32 %v781_v7, %v777_v9 }
 0xef2   :  { %785 = vrot.lane.b32.xlu0 %v783_v10, %s2729_s14 }
 0xf64   :  { %v786_v12 = vpop.permute.xlu0 %785 }
 0xf65   :  { %v788_v13 = vadd.f32 %v786_v12, %v778_v8 }
 0xf67   :  { %2611 = vtanh.f32 %v788_v13 }
 0xf74   :  { %v2612_v14 = vpop.eup %2611 }
 0xf75   :  { %791 = vrot.lane.b32.xlu1 %v2612_v14, %s2728_s11 }
 0xfe7   :  { %v792_v15 = vpop.permute.xlu1 %791 }
 0xfe8   :  { %v794_v16 = vmul.f32 %v792_v15, %v777_v9 }
 0xfea   :  { %796 = vrot.lane.b32.xlu0 %v794_v16, %s2729_s14 }
0x105c   :  { %v797_v19 = vpop.permute.xlu0 %796 }
0x105d   :  { %799 = vst.msk [vmem:[#allocation2 + $0x28] sm:$0xff] %vm206_vm2, %v797_v19  ;;  %2428 = vmatmul.mubr.msk.f32.vlgmr.msra.gmra.mxu0 %vm206_vm2, %v797_v19 }
0x105e   :  { %2442 = vmatpush3.msra.mxu0 %v2195_v60  ;;  %2449 = vmatprep.mubr.msk.f32.mxu0 %vm206_vm2, %v1002_v22 }
0x105f   :  { %2443 = vmatprep.subr.mxu0 %v2194_v20 }
0x1060   :  { %2444 = vmatpush3.msra.mxu0 %v2194_v20 }
0x1061   :  { %2445 = vmatprep.subr.mxu0 %v2193_v23 }
0x1062   :  { %2446 = vmatpush3.msra.mxu0 %v2193_v23 }
0x1063   :  { %2447 = vmatprep.subr.mxu0 %v2192_v24 }
0x1064   :  { %2448 = vmatpush3.msra.mxu0 %v2192_v24  ;;  %v1007_v29 = vld [vmem:[#allocation2 + $0x28] sm:$0xff] }
0x1065   :  { %2450 = vmatmul.mubr.msk.f32.vlgmr.msra.gmra.mxu0 %vm206_vm2, %v1003_v25  ;;  %2483 = vmatprep.subr.mxu0 %v2726_v0 }
0x1066   :  { %2452 = vmatprep.mubr.msk.f32.mxu0 %vm206_vm2, %v1004_v26  ;;  %2484 = vmatpush3.msra.mxu0 %v3036_v43 }
0x1067   :  { %2485 = vmatprep.subr.mxu0 %v2726_v0 }
0x1068   :  { %2486 = vmatpush3.msra.mxu0 %v3039_v44 }
0x1069   :  { %2453 = vmatmul.mubr.msk.f32.gmra.mxu0 %vm206_vm2, %v1005_v27  ;;  %2487 = vmatprep.subr.mxu0 %v2726_v0 }
0x106a   :  { %2455 = vmatprep.mubr.msk.f32.mxu0 %vm206_vm2, %v1006_v28  ;;  %2488 = vmatpush3.msra.mxu0 %v3043_v45 }
0x106b   :  { %2489 = vmatprep.subr.mxu0 %v2726_v0 }
0x106c   :  { %2490 = vmatpush3.msra.mxu0 %v3047_v46 }
0x106d   :  { %2456 = vmatmul.mubr.msk.f32.gmra.mxu0 %vm206_vm2, %v1007_v29  ;;  %2505 = vmatprep.subr.mxu0 %v2726_v0 }
0x111d   :  { %v868_v31 = vpop.f32.mrf.mxu0 }
0x111e   :  { %v869_v32 = vadd.f32 %v868_v31, %v196_v30 }
0x111f   :  { %v2429_v33 = vpop.f32.mrf.mxu0 }
0x1120   :  { %2613 = vtanh.f32 %v869_v32 }
0x1125   :  { %v2451_v54 = vpop.f32.mrf.mxu0 }
0x1126   :  { %v1124_v31 = vadd.f32 %v2451_v54, %v3089_v59 }
0x1127   :  { %v1118_v58 = vpop.f32.mrf.mxu0 }
0x1128   :  { %v1119_v2 = vadd.f32 %v3089_v59, %v1118_v58 }
0x112d   :  { %v2614_v34 = vpop.eup %2613 }
0x112e   :  { %v873_v35 = vmul.f32 0.5, %v2614_v34 }
0x1130   :  { %v874_v36 = vadd.f32 0.5, %v873_v35 }
0x1132   :  { %v875_v37 = vsel %vm2861_vm5, %v2614_v34, %v874_v36 }
0x1133   :  { %878 = vrot.lane.b32.xlu1 %v875_v37, %s2728_s11  ;;  %v876_v40 = vmul.f32 %v875_v37, %v788_v13 }
0x11a5   :  { %v879_v38 = vpop.permute.xlu1 %878 }
0x11a6   :  { %v881_v39 = vmul.f32 %v879_v38, %v875_v37 }
0x11a8   :  { %883 = vrot.lane.b32.xlu0 %v881_v39, %s2729_s14 }
0x121a   :  { %v884_v41 = vpop.permute.xlu0 %883 }
0x121b   :  { %v3032_v42 = vadd.f32 %v884_v41, %v876_v40 }
0x121d   :  { %2615 = vtanh.f32 %v3032_v42 }
0x122a   :  { %v2616_v63 = vpop.eup %2615 }
0x122b   :  { %889 = vrot.lane.b32.xlu1 %v2616_v63, %s2728_s11 }
0x129d   :  { %v890_v47 = vpop.permute.xlu1 %889 }
0x129e   :  { %v892_v48 = vmul.f32 %v890_v47, %v875_v37 }
0x12a0   :  { %894 = vrot.lane.b32.xlu0 %v892_v48, %s2729_s14 }
0x12a4   :  { %1239 = vrot.lane.b32.xlu0 %v2207_v49, %s2729_s14 }
0x1312   :  { %v895_v50 = vpop.permute.xlu0 %894 }
0x1313   :  { %897 = vst.msk [vmem:[#allocation2 + $0x30] sm:$0xff] %vm206_vm2, %v895_v50  ;;  %2439 = vmatmul.mubr.msk.f32.vlgmr.msra.gmra.mxu1 %vm206_vm2, %v895_v50 }
0x1314   :  { %2462 = vmatpush3.msra.mxu1 %v3036_v43  ;;  %2469 = vmatprep.mubr.msk.f32.mxu1 %vm2727_vm0, %v2726_v0 }
0x1315   :  { %2463 = vmatprep.subr.mxu1 %v2726_v0 }
0x1316   :  { %2464 = vmatpush3.msra.mxu1 %v3039_v44  ;;  %v1240_v7 = vpop.permute.xlu0 %1239 }
0x1317   :  { %2465 = vmatprep.subr.mxu1 %v2726_v0 }
0x1318   :  { %2466 = vmatpush3.msra.mxu1 %v3043_v45 }
0x1319   :  { %2467 = vmatprep.subr.mxu1 %v2726_v0 }
0x131a   :  { %2468 = vmatpush3.msra.mxu1 %v3047_v46  ;;  %v1008_v52 = vld [vmem:[#allocation2 + $0x30] sm:$0xff] }
0x131b   :  { %2470 = vmatmul.mubr.msk.f32.vlgmr.msra.gmra.mxu1 %vm206_vm2, %v2206_v51  ;;  %2458 = vmatprep.mubr.msk.f32.mxu0 %vm206_vm2, %v1008_v52 }
0x131c   :  { %2472 = vmatprep.subr.mxu1 %v2726_v0  ;;  %2480 = vmatprep.mubr.msk.f32.mxu1 %vm2727_vm0, %v2726_v0 }
0x131d   :  { %2473 = vmatpush3.msra.mxu1 %v3036_v43 }
0x131e   :  { %2474 = vmatprep.subr.mxu1 %v2726_v0 }
0x131f   :  { %2475 = vmatpush3.msra.mxu1 %v3039_v44 }
0x1320   :  { %2476 = vmatprep.subr.mxu1 %v2726_v0 }
0x1321   :  { %2477 = vmatpush3.msra.mxu1 %v3043_v45 }
0x1322   :  { %2478 = vmatprep.subr.mxu1 %v2726_v0 }
0x1323   :  { %2479 = vmatpush3.msra.mxu1 %v3047_v46 }
0x1324   :  { %2494 = vmatprep.subr.mxu1 %v2726_v0 }
0x13d3   :  { %v966_v55 = vpop.f32.mrf.mxu1 }
0x13d4   :  { %v967_v56 = vadd.f32 %v966_v55, %v201_v53  ;;  %v2454_v53 = vpop.f32.mrf.mxu0 }
0x13d5   :  { %v2440_v57 = vpop.f32.mrf.mxu1 }
0x13d6   :  { %v1128_v54 = vpop.f32.mrf.mxu0 }
0x13d8   :  { %v3144_v55 = vpop.f32.mrf.mxu0 }
0x13db   :  { %v1230_v61 = vpop.f32.mrf.mxu1 }
0x13dc   :  { %v1231_v1 = vadd.f32 %v1230_v61, %v1119_v2  ;;  %v1129_v2 = vadd.f32 %v3089_v59, %v1128_v54 }
0x13dd   :  { %v2471_v3 = vpop.f32.mrf.mxu1 }
0x13de   :  { %2617 = vtanh.f32 %v1231_v1 }
0x13df   :  { %2619 = vtanh.f32 %v967_v56  ;;  %v3146_v56 = vpop.f32.mrf.mxu0 }
0x13eb   :  { %v2618_v5 = vpop.eup %2617 }
0x13ec   :  { %v1235_v6 = vmul.f32 0.5, %v2618_v5  ;;  %v2620_v13 = vpop.eup %2619 }
0x13ed   :  { %v971_v60 = vmul.f32 0.5, %v2620_v13 }
0x13ee   :  { %v1236_v4 = vadd.f32 0.5, %v1235_v6 }
0x13ef   :  { %v972_v15 = vadd.f32 0.5, %v971_v60 }
0x13f0   :  { %v1237_v11 = vsel %vm2861_vm5, %v2618_v5, %v1236_v4 }
0x13f1   :  { %1244 = vrot.lane.b32.xlu1 %v1237_v11, %s2728_s11  ;;  %v1242_v10 = vmul.f32 %v1240_v7, %v1237_v11  ;;  %v973_v16 = vsel %vm2861_vm5, %v2620_v13, %v972_v15  ;;  %v1134_v15 = vadd.f32 %v2454_v53, %v3089_v59 }
0x13f2   :  { %v974_v25 = vmul.f32 %v973_v16, %v3032_v42 }
0x1463   :  { %v1245_v62 = vpop.permute.xlu1 %1244 }
0x1464   :  { %v1247_v9 = vmul.f32 %v1245_v62, %v1237_v11 }
0x1466   :  { %1249 = vrot.lane.b32.xlu1 %v1247_v9, %s2729_s14 }
0x14d8   :  { %v1250_v8 = vpop.permute.xlu1 %1249 }
0x14d9   :  { %v1252_v12 = vadd.f32 %v1250_v8, %v1242_v10 }
0x14db   :  { %2621 = vtanh.f32 %v1252_v12 }
0x14e8   :  { %v2622_v14 = vpop.eup %2621 }
0x14e9   :  { %1255 = vrot.lane.b32.xlu0 %v2622_v14, %s2728_s11 }
0x14ed   :  { %976 = vrot.lane.b32.xlu0 %v973_v16, %s2728_s11 }
0x155b   :  { %v1256_v19 = vpop.permute.xlu0 %1255 }
0x155c   :  { %v1258_v20 = vmul.f32 %v1256_v19, %v1237_v11 }
0x155e   :  { %1260 = vrot.lane.b32.xlu1 %v1258_v20, %s2729_s14 }
0x155f   :  { %v977_v22 = vpop.permute.xlu0 %976 }
0x1560   :  { %v979_v23 = vmul.f32 %v977_v22, %v973_v16 }
0x1562   :  { %981 = vrot.lane.b32.xlu0 %v979_v23, %s2729_s14 }
0x15d0   :  { %v1261_v24 = vpop.permute.xlu1 %1260 }
0x15d1   :  { %1263 = vst.msk [vmem:[#allocation2] sm:$0xff] %vm206_vm2, %v1261_v24  ;;  %2481 = vmatmul.mubr.msk.f32.vlgmr.msra.gmra.mxu1 %vm206_vm2, %v1261_v24 }
0x15d2   :  { %2495 = vmatpush3.msra.mxu1 %v3036_v43  ;;  %2502 = vmatprep.mubr.msk.f32.mxu1 %vm2727_vm0, %v2726_v0 }
0x15d3   :  { %2496 = vmatprep.subr.mxu1 %v2726_v0 }
0x15d4   :  { %v982_v26 = vpop.permute.xlu0 %981  ;;  %2497 = vmatpush3.msra.mxu1 %v3039_v44 }
0x15d5   :  { %v3110_v27 = vadd.f32 %v982_v26, %v974_v25  ;;  %2498 = vmatprep.subr.mxu1 %v2726_v0 }
0x15d6   :  { %2499 = vmatpush3.msra.mxu1 %v3043_v45 }
0x15d7   :  { %2623 = vtanh.f32 %v3110_v27  ;;  %2500 = vmatprep.subr.mxu1 %v2726_v0 }
0x15d8   :  { %2501 = vmatpush3.msra.mxu1 %v3047_v46 }
0x15d9   :  { %2516 = vmatprep.subr.mxu1 %v2726_v0 }
0x15e4   :  { %v2624_v28 = vpop.eup %2623 }
0x15e5   :  { %987 = vrot.lane.b32.xlu0 %v2624_v28, %s2728_s11 }
0x1657   :  { %v988_v29 = vpop.permute.xlu0 %987 }
0x1658   :  { %v990_v30 = vmul.f32 %v988_v29, %v973_v16 }
0x165a   :  { %992 = vrot.lane.b32.xlu0 %v990_v30, %s2729_s14 }
0x1691   :  { %v1332_v32 = vpop.f32.mrf.mxu1 }
0x1692   :  { %v1333_v33 = vadd.f32 %v1332_v32, %v1124_v31 }
0x1693   :  { %v2482_v34 = vpop.f32.mrf.mxu1 }
0x1694   :  { %2625 = vtanh.f32 %v1333_v33 }
0x16a1   :  { %v2626_v35 = vpop.eup %2625 }
0x16a2   :  { %v1337_v36 = vmul.f32 0.5, %v2626_v35 }
0x16a4   :  { %v1338_v37 = vadd.f32 0.5, %v1337_v36  ;;  %v1139_v36 = vadd.f32 %v3089_v59, %v3146_v56 }
0x16a6   :  { %v1339_v38 = vsel %vm2861_vm5, %v2626_v35, %v1338_v37 }
0x16a7   :  { %1342 = vrot.lane.b32.xlu1 %v1339_v38, %s2728_s11  ;;  %v1340_v63 = vmul.f32 %v1339_v38, %v1252_v12 }
0x16cc   :  { %v993_v39 = vpop.permute.xlu0 %992 }
0x16cd   :  { %995 = vst.msk [vmem:[#allocation2 + $0x38] sm:$0xff] %vm206_vm2, %v993_v39  ;;  %996 = vst.msk [vmem:[#allocation6] sm:$0xff] %vm206_vm2, %v993_v39 }
0x16d4   :  { %v1009_v40 = vld [vmem:[#allocation2 + $0x38] sm:$0xff] }
0x16d5   :  { %2459 = vmatmul.mubr.msk.f32.gmra.mxu0 %vm206_vm2, %v1009_v40 }
0x16d6   :  { %2491 = vmatprep.mubr.msk.f32.mxu0 %vm2727_vm0, %v2726_v0 }
0x1719   :  { %v1343_v41 = vpop.permute.xlu1 %1342 }
0x171a   :  { %v1345_v42 = vmul.f32 %v1343_v41, %v1339_v38 }
0x171c   :  { %1347 = vrot.lane.b32.xlu1 %v1345_v42, %s2729_s14 }
0x178e   :  { %v1348_v47 = vpop.permute.xlu1 %1347 }
0x178f   :  { %v1350_v48 = vadd.f32 %v1348_v47, %v1340_v63 }
0x1791   :  { %2627 = vtanh.f32 %v1350_v48 }
0x1795   :  { %v3148_v57 = vpop.f32.mrf.mxu0 }
0x1797   :  { %v3150_v58 = vpop.f32.mrf.mxu0 }
0x179e   :  { %v2628_v49 = vpop.eup %2627 }
0x179f   :  { %1353 = vrot.lane.b32.xlu1 %v2628_v49, %s2728_s11 }
0x1811   :  { %v1354_v50 = vpop.permute.xlu1 %1353 }
0x1812   :  { %v1356_v51 = vmul.f32 %v1354_v50, %v1339_v38 }
0x1814   :  { %1358 = vrot.lane.b32.xlu1 %v1356_v51, %s2729_s14 }
0x1886   :  { %v1359_v52 = vpop.permute.xlu1 %1358 }
0x1887   :  { %1361 = vst.msk [vmem:[#allocation2 + $0x8] sm:$0xff] %vm206_vm2, %v1359_v52  ;;  %2492 = vmatmul.mubr.msk.f32.vlgmr.msra.gmra.mxu0 %vm206_vm2, %v1359_v52 }
0x1888   :  { %2506 = vmatpush3.msra.mxu0 %v3036_v43  ;;  %2513 = vmatprep.mubr.msk.f32.mxu0 %vm2727_vm0, %v2726_v0 }
0x1889   :  { %2507 = vmatprep.subr.mxu0 %v2726_v0 }
0x188a   :  { %2508 = vmatpush3.msra.mxu0 %v3039_v44 }
0x188b   :  { %2509 = vmatprep.subr.mxu0 %v2726_v0 }
0x188c   :  { %2510 = vmatpush3.msra.mxu0 %v3043_v45 }
0x188d   :  { %2511 = vmatprep.subr.mxu0 %v2726_v0 }
0x188e   :  { %2512 = vmatpush3.msra.mxu0 %v3047_v46 }
0x188f   :  { %2527 = vmatprep.subr.mxu0 %v2726_v0 }
0x1947   :  { %v1430_v61 = vpop.f32.mrf.mxu0 }
0x1948   :  { %v1431_v1 = vadd.f32 %v1430_v61, %v1129_v2 }
0x1949   :  { %v2493_v3 = vpop.f32.mrf.mxu0 }
0x194a   :  { %2629 = vtanh.f32 %v1431_v1 }
0x1957   :  { %v2630_v5 = vpop.eup %2629 }
0x1958   :  { %v1435_v6 = vmul.f32 0.5, %v2630_v5 }
0x195a   :  { %v1436_v4 = vadd.f32 0.5, %v1435_v6 }
0x195c   :  { %v1437_v11 = vsel %vm2861_vm5, %v2630_v5, %v1436_v4 }
0x195d   :  { %1440 = vrot.lane.b32.xlu0 %v1437_v11, %s2728_s11  ;;  %v1438_v7 = vmul.f32 %v1437_v11, %v1350_v48 }
0x19cf   :  { %v1441_v62 = vpop.permute.xlu0 %1440 }
0x19d0   :  { %v1443_v9 = vmul.f32 %v1441_v62, %v1437_v11 }
0x19d2   :  { %1445 = vrot.lane.b32.xlu1 %v1443_v9, %s2729_s14 }
0x1a44   :  { %v1446_v10 = vpop.permute.xlu1 %1445 }
0x1a45   :  { %v1448_v8 = vadd.f32 %v1446_v10, %v1438_v7 }
0x1a47   :  { %2631 = vtanh.f32 %v1448_v8 }
0x1a54   :  { %v2632_v12 = vpop.eup %2631 }
0x1a55   :  { %1451 = vrot.lane.b32.xlu0 %v2632_v12, %s2728_s11 }
0x1ac7   :  { %v1452_v13 = vpop.permute.xlu0 %1451 }
0x1ac8   :  { %v1454_v60 = vmul.f32 %v1452_v13, %v1437_v11 }
0x1aca   :  { %1456 = vrot.lane.b32.xlu1 %v1454_v60, %s2729_s14 }
0x1b3c   :  { %v1457_v14 = vpop.permute.xlu1 %1456 }
0x1b3d   :  { %1459 = vst.msk [vmem:[#allocation2 + $0x10] sm:$0xff] %vm206_vm2, %v1457_v14  ;;  %2503 = vmatmul.mubr.msk.f32.vlgmr.msra.gmra.mxu1 %vm206_vm2, %v1457_v14 }
0x1b3e   :  { %2517 = vmatpush3.msra.mxu1 %v3036_v43  ;;  %2524 = vmatprep.mubr.msk.f32.mxu1 %vm2727_vm0, %v2726_v0 }
0x1b3f   :  { %2518 = vmatprep.subr.mxu1 %v2726_v0 }
0x1b40   :  { %2519 = vmatpush3.msra.mxu1 %v3039_v44 }
0x1b41   :  { %2520 = vmatprep.subr.mxu1 %v2726_v0 }
0x1b42   :  { %2521 = vmatpush3.msra.mxu1 %v3043_v45 }
0x1b43   :  { %2522 = vmatprep.subr.mxu1 %v2726_v0 }
0x1b44   :  { %2523 = vmatpush3.msra.mxu1 %v3047_v46 }
0x1b45   :  { %2538 = vmatprep.subr.mxu1 %v2726_v0 }
0x1bfd   :  { %v1528_v16 = vpop.f32.mrf.mxu1 }
0x1bfe   :  { %v1529_v19 = vadd.f32 %v1528_v16, %v1134_v15 }
0x1bff   :  { %v2504_v20 = vpop.f32.mrf.mxu1 }
0x1c00   :  { %2633 = vtanh.f32 %v1529_v19 }
0x1c0d   :  { %v2634_v22 = vpop.eup %2633 }
0x1c0e   :  { %v1533_v23 = vmul.f32 0.5, %v2634_v22 }
0x1c10   :  { %v1534_v24 = vadd.f32 0.5, %v1533_v23 }
0x1c12   :  { %v1535_v25 = vsel %vm2861_vm5, %v2634_v22, %v1534_v24 }
0x1c13   :  { %1538 = vrot.lane.b32.xlu0 %v1535_v25, %s2728_s11  ;;  %v1536_v29 = vmul.f32 %v1535_v25, %v1448_v8  ;;  %v1149_v8 = vadd.f32 %v3089_v59, %v3150_v58 }
0x1c85   :  { %v1539_v26 = vpop.permute.xlu0 %1538 }
0x1c86   :  { %v1541_v28 = vmul.f32 %v1539_v26, %v1535_v25 }
0x1c88   :  { %1543 = vrot.lane.b32.xlu1 %v1541_v28, %s2729_s14 }
0x1cfa   :  { %v1544_v30 = vpop.permute.xlu1 %1543 }
0x1cfb   :  { %v1546_v31 = vadd.f32 %v1544_v30, %v1536_v29  ;;  %v1154_v30 = vadd.f32 %v3148_v57, %v3089_v59 }
0x1cfd   :  { %2635 = vtanh.f32 %v1546_v31 }
0x1d0a   :  { %v2636_v32 = vpop.eup %2635 }
0x1d0b   :  { %1549 = vrot.lane.b32.xlu0 %v2636_v32, %s2728_s11 }
0x1d7d   :  { %v1550_v33 = vpop.permute.xlu0 %1549 }
0x1d7e   :  { %v1552_v34 = vmul.f32 %v1550_v33, %v1535_v25 }
0x1d80   :  { %1554 = vrot.lane.b32.xlu1 %v1552_v34, %s2729_s14 }
0x1df2   :  { %v1555_v35 = vpop.permute.xlu1 %1554 }
0x1df3   :  { %1557 = vst.msk [vmem:[#allocation2 + $0x18] sm:$0xff] %vm206_vm2, %v1555_v35  ;;  %2514 = vmatmul.mubr.msk.f32.vlgmr.msra.gmra.mxu0 %vm206_vm2, %v1555_v35 }
0x1df4   :  { %2528 = vmatpush3.msra.mxu0 %v3036_v43  ;;  %2535 = vmatprep.mubr.msk.f32.mxu0 %vm2727_vm0, %v2726_v0 }
0x1df5   :  { %2529 = vmatprep.subr.mxu0 %v2726_v0 }
0x1df6   :  { %2530 = vmatpush3.msra.mxu0 %v3039_v44 }
0x1df7   :  { %2531 = vmatprep.subr.mxu0 %v2726_v0 }
0x1df8   :  { %2532 = vmatpush3.msra.mxu0 %v3043_v45 }
0x1df9   :  { %2533 = vmatprep.subr.mxu0 %v2726_v0 }
0x1dfa   :  { %2534 = vmatpush3.msra.mxu0 %v3047_v46 }
0x1dfb   :  { %2549 = vmatprep.subr.mxu0 %v2726_v0 }
0x1eb3   :  { %v1626_v37 = vpop.f32.mrf.mxu0 }
0x1eb4   :  { %v1627_v38 = vadd.f32 %v1626_v37, %v1139_v36 }
0x1eb5   :  { %v2515_v39 = vpop.f32.mrf.mxu0 }
0x1eb6   :  { %2637 = vtanh.f32 %v1627_v38 }
0x1ec3   :  { %v2638_v40 = vpop.eup %2637 }
0x1ec4   :  { %v1631_v41 = vmul.f32 0.5, %v2638_v40 }
0x1ec6   :  { %v1632_v42 = vadd.f32 0.5, %v1631_v41 }
0x1ec8   :  { %v1633_v63 = vsel %vm2861_vm5, %v2638_v40, %v1632_v42 }
0x1ec9   :  { %1636 = vrot.lane.b32.xlu0 %v1633_v63, %s2728_s11  ;;  %v1634_v49 = vmul.f32 %v1633_v63, %v1546_v31 }
0x1f3b   :  { %v1637_v47 = vpop.permute.xlu0 %1636 }
0x1f3c   :  { %v1639_v48 = vmul.f32 %v1637_v47, %v1633_v63  ;;  %v2049_v47 = vld [vmem:[%s3297_s6 + $0x18] sm:$0xff] }
0x1f3e   :  { %1641 = vrot.lane.b32.xlu1 %v1639_v48, %s2729_s14  ;;  %v2048_v48 = vld [vmem:[%s3297_s6 + $0x10] sm:$0xff] }
0x1fb0   :  { %v1642_v50 = vpop.permute.xlu1 %1641 }
0x1fb1   :  { %v1644_v51 = vadd.f32 %v1642_v50, %v1634_v49 }
0x1fb3   :  { %2639 = vtanh.f32 %v1644_v51 }
0x1fc0   :  { %v2640_v52 = vpop.eup %2639 }
0x1fc1   :  { %1647 = vrot.lane.b32.xlu0 %v2640_v52, %s2728_s11 }
0x2033   :  { %v1648_v53 = vpop.permute.xlu0 %1647 }
0x2034   :  { %v1650_v54 = vmul.f32 %v1648_v53, %v1633_v63  ;;  %v1959_v53 = vshrl.u32 %v48_v17, 7  ;;  %v1965_v17 = vld [vmem:[#allocation2 + $0x8] sm:$0xff] }
0x2036   :  { %1652 = vrot.lane.b32.xlu1 %v1650_v54, %s2729_s14 }
0x20a8   :  { %v1653_v56 = vpop.permute.xlu1 %1652 }
0x20a9   :  { %1655 = vst.msk [vmem:[#allocation2 + $0x20] sm:$0xff] %vm206_vm2, %v1653_v56  ;;  %2525 = vmatmul.mubr.msk.f32.vlgmr.msra.gmra.mxu1 %vm206_vm2, %v1653_v56 }
0x20aa   :  { %2539 = vmatpush3.msra.mxu1 %v3036_v43  ;;  %2546 = vmatprep.mubr.msk.f32.mxu1 %vm2727_vm0, %v2726_v0  ;;  %v1144_v43 = vadd.f32 %v3144_v55, %v3089_v59 }
0x20ab   :  { %2540 = vmatprep.subr.mxu1 %v2726_v0 }
0x20ac   :  { %2541 = vmatpush3.msra.mxu1 %v3039_v44 }
0x20ad   :  { %2542 = vmatprep.subr.mxu1 %v2726_v0 }
0x20ae   :  { %2543 = vmatpush3.msra.mxu1 %v3043_v45 }
0x20af   :  { %2544 = vmatprep.subr.mxu1 %v2726_v0 }
0x20b0   :  { %2545 = vmatpush3.msra.mxu1 %v3047_v46  ;;  %v1968_v56 = vld [vmem:[#allocation2 + $0x20] sm:$0xff] }
0x20b1   :  { %2568 = vmatprep.subr.mxu1 %v2726_v0 }
0x2169   :  { %v1724_v2 = vpop.f32.mrf.mxu1 }
0x216a   :  { %v1725_v61 = vadd.f32 %v1724_v2, %v1144_v43  ;;  %v1960_v43 = vmul.u32 8, %v1959_v53  ;;  %v1967_v2 = vld [vmem:[#allocation2 + $0x18] sm:$0xff] }
0x216b   :  { %v2526_v1 = vpop.f32.mrf.mxu1 }
0x216c   :  { %2641 = vtanh.f32 %v1725_v61  ;;  %v1966_v61 = vld [vmem:[#allocation2 + $0x10] sm:$0xff]  ;;  %vm1961_vm6 = vcmp.eq.s32.totalorder %v2857_v18, %v1960_v43 }
0x216d   :  { %v2216_v1 = vsel %vm1961_vm6, 1.0, %v2726_v0 }
0x2179   :  { %v2642_v3 = vpop.eup %2641 }
0x217a   :  { %v1729_v5 = vmul.f32 0.5, %v2642_v3 }
0x217c   :  { %v1730_v44 = vadd.f32 0.5, %v1729_v5  ;;  %v2046_v5 = vld [vmem:[%s3297_s6] sm:$0xff] }
0x217e   :  { %v1731_v6 = vsel %vm2861_vm5, %v2642_v3, %v1730_v44  ;;  %v1964_v3 = vld [vmem:[#allocation2] sm:$0xff] }
0x217f   :  { %1734 = vrot.lane.b32.xlu0 %v1731_v6, %s2728_s11  ;;  %v1732_v46 = vmul.f32 %v1731_v6, %v1644_v51 }
0x21f1   :  { %v1735_v45 = vpop.permute.xlu0 %1734 }
0x21f2   :  { %v1737_v4 = vmul.f32 %v1735_v45, %v1731_v6 }
0x21f4   :  { %1739 = vrot.lane.b32.xlu1 %v1737_v4, %s2729_s14 }
0x2266   :  { %v1740_v11 = vpop.permute.xlu1 %1739 }
0x2267   :  { %v1742_v62 = vadd.f32 %v1740_v11, %v1732_v46 }
0x2269   :  { %2643 = vtanh.f32 %v1742_v62 }
0x2276   :  { %v2644_v55 = vpop.eup %2643 }
0x2277   :  { %1745 = vrot.lane.b32.xlu0 %v2644_v55, %s2728_s11 }
0x22e9   :  { %v1746_v9 = vpop.permute.xlu0 %1745 }
0x22ea   :  { %v1748_v7 = vmul.f32 %v1746_v9, %v1731_v6 }
0x22ec   :  { %1750 = vrot.lane.b32.xlu1 %v1748_v7, %s2729_s14 }
0x235e   :  { %v1751_v10 = vpop.permute.xlu1 %1750 }
0x235f   :  { %1753 = vst.msk [vmem:[#allocation2 + $0x28] sm:$0xff] %vm206_vm2, %v1751_v10  ;;  %2536 = vmatmul.mubr.msk.f32.vlgmr.msra.gmra.mxu0 %vm206_vm2, %v1751_v10 }
0x2360   :  { %2565 = vmatprep.mubr.msk.f32.mxu0 %vm2727_vm0, %v2726_v0 }
0x2366   :  { %v1969_v54 = vld [vmem:[#allocation2 + $0x28] sm:$0xff] }
0x241f   :  { %v1822_v12 = vpop.f32.mrf.mxu0 }
0x2420   :  { %v1823_v13 = vadd.f32 %v1822_v12, %v1149_v8 }
0x2421   :  { %v2537_v60 = vpop.f32.mrf.mxu0 }
0x2422   :  { %2645 = vtanh.f32 %v1823_v13 }
0x242f   :  { %v2646_v14 = vpop.eup %2645 }
0x2430   :  { %v1827_v15 = vmul.f32 0.5, %v2646_v14 }
0x2432   :  { %v1828_v16 = vadd.f32 0.5, %v1827_v15 }
0x2434   :  { %v1829_v19 = vsel %vm2861_vm5, %v2646_v14, %v1828_v16 }
0x2435   :  { %1832 = vrot.lane.b32.xlu0 %v1829_v19, %s2728_s11  ;;  %v1830_v23 = vmul.f32 %v1829_v19, %v1742_v62 }
0x24a7   :  { %v1833_v20 = vpop.permute.xlu0 %1832 }
0x24a8   :  { %v1835_v22 = vmul.f32 %v1833_v20, %v1829_v19 }
0x24aa   :  { %1837 = vrot.lane.b32.xlu1 %v1835_v22, %s2729_s14 }
0x251c   :  { %v1838_v24 = vpop.permute.xlu1 %1837 }
0x251d   :  { %v1840_v25 = vadd.f32 %v1838_v24, %v1830_v23 }
0x251f   :  { %2647 = vtanh.f32 %v1840_v25 }
0x252c   :  { %v2648_v58 = vpop.eup %2647 }
0x252d   :  { %1843 = vrot.lane.b32.xlu0 %v2648_v58, %s2728_s11 }
0x259f   :  { %v1844_v26 = vpop.permute.xlu0 %1843 }
0x25a0   :  { %v1846_v28 = vmul.f32 %v1844_v26, %v1829_v19 }
0x25a2   :  { %1848 = vrot.lane.b32.xlu1 %v1846_v28, %s2729_s14 }
0x2614   :  { %v1849_v29 = vpop.permute.xlu1 %1848 }
0x2615   :  { %1851 = vst.msk [vmem:[#allocation2 + $0x30] sm:$0xff] %vm206_vm2, %v1849_v29  ;;  %2547 = vmatmul.mubr.msk.f32.vlgmr.msra.gmra.mxu1 %vm206_vm2, %v1849_v29 }
0x2616   :  { %2576 = vmatprep.mubr.msk.f32.mxu1 %vm2727_vm0, %v2726_v0  ;;  %2569 = vmatpush3.msra.mxu1 %v2049_v47 }
0x2617   :  { %2570 = vmatprep.subr.mxu1 %v2726_v0 }
0x2618   :  { %2571 = vmatpush3.msra.mxu1 %v2048_v48 }
0x2619   :  { %2572 = vmatprep.subr.mxu1 %v2726_v0 }
0x261c   :  { %v1970_v52 = vld [vmem:[#allocation2 + $0x30] sm:$0xff] }
0x26d5   :  { %v1920_v31 = vpop.f32.mrf.mxu1 }
0x26d6   :  { %v1921_v32 = vadd.f32 %v1920_v31, %v1154_v30 }
0x26d7   :  { %v2548_v33 = vpop.f32.mrf.mxu1 }
0x26d8   :  { %2649 = vtanh.f32 %v1921_v32 }
0x26e5   :  { %v2650_v34 = vpop.eup %2649 }
0x26e6   :  { %v1925_v35 = vmul.f32 0.5, %v2650_v34 }
0x26e8   :  { %v1926_v36 = vadd.f32 0.5, %v1925_v35 }
0x26ea   :  { %v1927_v37 = vsel %vm2861_vm5, %v2650_v34, %v1926_v36 }
0x26eb   :  { %1930 = vrot.lane.b32.xlu0 %v1927_v37, %s2728_s11  ;;  %v1928_v40 = vmul.f32 %v1927_v37, %v1840_v25 }
0x275d   :  { %v1931_v38 = vpop.permute.xlu0 %1930 }
0x275e   :  { %v1933_v39 = vmul.f32 %v1931_v38, %v1927_v37 }
0x2760   :  { %1935 = vrot.lane.b32.xlu1 %v1933_v39, %s2729_s14 }
0x27d2   :  { %v1936_v41 = vpop.permute.xlu1 %1935 }
0x27d3   :  { %v1938_v42 = vadd.f32 %v1936_v41, %v1928_v40 }
0x27d5   :  { %2651 = vtanh.f32 %v1938_v42 }
0x27e2   :  { %v2652_v59 = vpop.eup %2651 }
0x27e3   :  { %1941 = vrot.lane.b32.xlu0 %v2652_v59, %s2728_s11 }
0x27e7   :  { %998 = vrot.lane.b32.xlu0 %v3110_v27, %s2730_s3  ;;  %v2047_v27 = vld [vmem:[%s3297_s6 + $0x8] sm:$0xff] }
0x27e8   :  { %2573 = vmatpush3.msra.mxu1 %v2047_v27 }
0x27e9   :  { %2574 = vmatprep.subr.mxu1 %v2726_v0 }
0x27ea   :  { %2575 = vmatpush3.msra.mxu1 %v2046_v5 }
0x2855   :  { %v1942_v57 = vpop.permute.xlu0 %1941 }
0x2856   :  { %v1944_v63 = vmul.f32 %v1942_v57, %v1927_v37 }
0x2858   :  { %1946 = vrot.lane.b32.xlu1 %v1944_v63, %s2729_s14 }
0x2859   :  { %v999_v21 = vpop.permute.xlu0 %998 }
0x285a   :  { %1001 = vst.msk [vmem:[#allocation7] sm:$0xff] %vm206_vm2, %v999_v21 }
0x285c   :  { %1953 = vrot.lane.b32.xlu1 %v1938_v42, %s2730_s3 }
0x28ca   :  { %v1947_v49 = vpop.permute.xlu1 %1946 }
0x28cb   :  { %1949 = vst.msk [vmem:[#allocation2 + $0x38] sm:$0xff] %vm206_vm2, %v1947_v49  ;;  %1951 = vst.msk [vmem:[#allocation6 + $0x8] sm:$0xff] %vm206_vm2, %v1947_v49 }
0x28ce   :  { %v1954_v50 = vpop.permute.xlu1 %1953 }
0x28cf   :  { %1957 = vst.msk [vmem:[#allocation7 + $0x8] sm:$0xff] %vm206_vm2, %v1954_v50 }
0x28d2   :  { %v1971_v51 = vld [vmem:[#allocation2 + $0x38] sm:$0xff] }
0x28d3   :  { %2550 = vmatpush3.msra.mxu0 %v1971_v51 }
0x28d4   :  { %2551 = vmatprep.subr.mxu0 %v2726_v0 }
0x28d5   :  { %2552 = vmatpush3.msra.mxu0 %v1970_v52 }
0x28d6   :  { %2553 = vmatprep.subr.mxu0 %v2726_v0 }
0x28d7   :  { %2554 = vmatpush3.msra.mxu0 %v1969_v54 }
0x28d8   :  { %2555 = vmatprep.subr.mxu0 %v2726_v0 }
0x28d9   :  { %2556 = vmatpush3.msra.mxu0 %v1968_v56 }
0x28da   :  { %2557 = vmatprep.subr.mxu0 %v2726_v0 }
0x28db   :  { %2558 = vmatpush3.msra.mxu0 %v1967_v2 }
0x28dc   :  { %2559 = vmatprep.subr.mxu0 %v2726_v0 }
0x28dd   :  { %2560 = vmatpush3.msra.mxu0 %v1966_v61 }
0x28de   :  { %2561 = vmatprep.subr.mxu0 %v2726_v0 }
0x28df   :  { %2562 = vmatpush3.msra.mxu0 %v1965_v17 }
0x28e0   :  { %2563 = vmatprep.subr.mxu0 %v2726_v0 }
0x28e1   :  { %2564 = vmatpush3.msra.mxu0 %v1964_v3 }
0x28e2   :  { %2566 = vmatmul.mubr.msk.f32.vlgmr.msra.gmra.mxu0 %vm1972_vm7, %v2216_v1 }
0x29a2   :  { %v2042_v44 = vpop.f32.mrf.mxu0 }
0x29a3   :  { %2577 = vmatmul.mubr.msk.f32.vlgmr.msra.gmra.mxu1 %vm206_vm2, %v2042_v44 }
0x29a4   :  { %v2567_v18 = vpop.f32.mrf.mxu0 }
0x29a5   :  { %2688 = shalt.err (!%p2685_p9)
}
0x29a6   :  { %2151 = dma.vmem_to_hbm [thread:$0]  %s2146_s0, 256, %s3300_s9, [#allocation5], %s2724_s16, %s2724_s16, %s2725_s17  }
0x29a7   :  { %s2697_s13 = scalar_lea.vmem %s2158_s29, 256  ;;  %p2702_p11 = scmp.lt.s32.totalorder %s2158_s29, %s2158_s29 }
0x29a8   :  { %p2698_p10 = scmp.ne.s32.totalorder %s2158_s29, %s2697_s13  ;;  %p2703_p12 = scmp.lt.s32.totalorder %s2697_s13, %s2697_s13 }
0x29aa   :  { %p2704_p13 = por %p2703_p12, %p2702_p11 }
0x29ac   :  { %p2705_p0 = pnand %p2704_p13, %p2698_p10 }
0x29ae   :  { %2708 = shalt.err (!%p2705_p0)
}
0x29af   :  { %2163 = dma.vmem_to_hbm [thread:$0]  %s2158_s29, 256, %s3301_s10, [#allocation8], %s2724_s16, %s2724_s16, %s2725_s17   ;;  %vm2136_vm8 = vcmask 31744  }
0x29b0   :  { %v2218_v0 = vld [vmem:[%s3298_s7] ss:$0 sm:$0xff] }
0x2a63   :  { %v2126_v6 = vpop.f32.mrf.mxu1 }
0x2a64   :  { %v2127_v45 = vadd.f32 %v2218_v0, %v2126_v6 }
0x2a65   :  { %v2578_v4 = vpop.f32.mrf.mxu1 }
0x2a66   :  { %v2220_v46 = vmul.f32 -1.442695, %v2127_v45 }
0x2a68   :  { %2653 = vpow2.f32 %v2220_v46 }
0x2a75   :  { %v2654_v11 = vpop.eup %2653 }
0x2a76   :  { %v2133_v62 = vadd.f32 1.0, %v2654_v11 }
0x2a78   :  { %2655 = vrcp.f32 %v2133_v62 }
0x2a85   :  { %v2656_v55 = vpop.eup %2655 }
0x2a86   :  { %2137 = vst.msk [vmem:[%s3299_s8] sm:$0xff] %vm2136_vm8, %v2656_v55 }
0x2a87   :  { %2719 = dma.done.wait [#allocation5], 256  }
0x2a88   :  { %2720 = vsyncadd [#allocation5], 4294967040 }
0x2a89   :  { %2721 = dma.done.wait [#allocation8], 256  }
0x2a8a   :  { %2722 = vsyncadd [#allocation8], 4294967040 }
0x2a8b   :  { %2172 = vsyncpa [#allocation4], 1 }
0x2a8c   :  { %2173 = vsyncpa [#allocation5], 1 }
0x2a8d   :  { %2174 = vsyncpa [#allocation8], 1 }

</bundles_post_ra>
